<compile_context>
chip_gen: v5e
topology: v5e:2x2
jax: 0.10.0
libtpu: 0.0.40
codegen_flags: <defaults>
</compile_context>

<pallas_src>
import functools

import jax
import jax.numpy as jnp
import numpy as np
from jax.experimental import pallas as pl
from jax.experimental.pallas import tpu as pltpu

LEAKY_SLOPE = 0.01   # nn.LeakyReLU() default
BN_EPS = 1e-5        # nn.BatchNorm2d default eps


def better_net_kernel(x_ref, sh_ref, wb_ref, msum_ref, g_ref, bt_ref, out_ref,
                      *, num_layers, inv_nhw):
    """Fused BetterNet forward.

    x_ref    : (N*H, W*C)        lane-dense activations / residual
    sh_ref   : (2, N*H, N*H)     row-shift matrices (input row h-1 / h+1, zero at edges)
    wb_ref   : (L*3, W*C, W*C)   block-banded conv weights, index 3*l + ky
    msum_ref : (W*C, W*C)        per-channel sum-and-broadcast matrix
    g_ref    : (L, 1, W*C)       BN gamma tiled over W
    bt_ref   : (L, 1, W*C)       BN beta  tiled over W
    out_ref  : (N*H, W*C)
    """
    f32 = jnp.float32
    x0 = x_ref[...]                       # residual, read once
    msum = msum_ref[...]
    sh_m1 = sh_ref[0]                     # picks input row h-1 (ky = 0)
    sh_p1 = sh_ref[1]                     # picks input row h+1 (ky = 2)

    act = x0
    for l in range(num_layers):
        # ---- 3x3 conv: 2 row-shift matmuls + 3 banded matmuls, all MXU; ----
        # ---- accumulation stays in registers / MRB (no VMEM RMW).        ----
        row_m1 = jnp.dot(sh_m1, act, preferred_element_type=f32)
        row_p1 = jnp.dot(sh_p1, act, preferred_element_type=f32)
        conv = (jnp.dot(row_m1, wb_ref[3 * l + 0], preferred_element_type=f32)
                + jnp.dot(act,    wb_ref[3 * l + 1], preferred_element_type=f32)
                + jnp.dot(row_p1, wb_ref[3 * l + 2], preferred_element_type=f32))

        # ---- BatchNorm2d, training-mode batch stats (biased var), two-pass ----
        mean = jnp.sum(jnp.dot(conv, msum, preferred_element_type=f32),
                       axis=0, keepdims=True) * inv_nhw                 # (1, W*C)
        cen = conv - mean
        var = jnp.sum(jnp.dot(cen * cen, msum, preferred_element_type=f32),
                      axis=0, keepdims=True) * inv_nhw                  # (1, W*C)
        scale = jax.lax.rsqrt(var + BN_EPS) * g_ref[l]                  # rsqrt -> EUP
        y = cen * scale + bt_ref[l]

        # ---- LeakyReLU ----
        act = jnp.where(y > 0, y, LEAKY_SLOPE * y)

    # Residual add fused into the lane-dense, aligned final store.
    out_ref[...] = act + x0


def better_net_forward(x_nchw, params):
    """params: list of (w(9, Cin, Cout), bias(Cout,), gamma(Cout,), beta(Cout,))."""
    N, Cin, H, W = x_nchw.shape
    C = params[0][0].shape[-1]
    L = len(params)
    # Same structural requirement as the PyTorch module's residual add.
    assert Cin == C, "residual add requires input_channels == middle_channels"
    for (w, _, _, _) in params:
        assert w.shape == (9, C, C)
    NH, WC = N * H, W * C
    f32 = jnp.float32

    # NCHW -> NHWC -> lane-dense (N*H, W*C); pure layout plumbing outside the kernel.
    x = jnp.transpose(x_nchw, (0, 2, 3, 1)).astype(f32).reshape(NH, WC)

    # Block-banded conv weights: wband[ky][wi*C+ci, wo*C+co] = w[ky, kx, ci, co] where
    # wi = wo + kx - 1 (zero outside the band == zero padding at the W edges).
    bands = []
    for (w9, _, _, _) in params:
        w9 = w9.astype(f32)
        for ky in range(3):
            band = jnp.zeros((WC, WC), f32)
            for kx in range(3):
                band = band + jnp.kron(jnp.eye(W, k=-(kx - 1), dtype=f32),
                                       w9[ky * 3 + kx])
            bands.append(band)
    wband = jnp.stack(bands)                                              # (L*3, WC, WC)

    # Row-shift matrices (block-diagonal per image; zero rows give the H-edge padding).
    shifts = jnp.stack([
        jnp.kron(jnp.eye(N, dtype=f32), jnp.eye(H, k=-1, dtype=f32)),     # row h-1
        jnp.kron(jnp.eye(N, dtype=f32), jnp.eye(H, k=1, dtype=f32)),      # row h+1
    ])                                                                    # (2, NH, NH)

    # Per-channel sum-and-broadcast matrix for BN stats in the (w, c) lane layout.
    msum = jnp.kron(jnp.ones((W, W), f32), jnp.eye(C, dtype=f32))         # (WC, WC)

    # BN affine params tiled over W.  Conv bias dropped (cancels in train-mode BN).
    g_all = jnp.stack([jnp.tile(p[2].astype(f32), W) for p in params]).reshape(L, 1, WC)
    bt_all = jnp.stack([jnp.tile(p[3].astype(f32), W) for p in params]).reshape(L, 1, WC)

    kernel = functools.partial(better_net_kernel, num_layers=L,
                               inv_nhw=1.0 / float(N * H * W))
    vspec = lambda: pl.BlockSpec(memory_space=pltpu.MemorySpace.VMEM)
    out = pl.pallas_call(
        kernel,
        out_shape=jax.ShapeDtypeStruct((NH, WC), f32),
        in_specs=[vspec() for _ in range(6)],
        out_specs=vspec(),
    )(x, shifts, wband, msum, g_all, bt_all)
    return jnp.transpose(out.reshape(N, H, W, C), (0, 3, 1, 2))          # -> NCHW


# ------------------------- pure-JAX reference (for checking) -------------------------
def reference_forward(x_nchw, params):
    x = x_nchw
    res = x
    for (w, b, g, bt) in params:
        w_hwio = w.reshape(3, 3, w.shape[1], w.shape[2])
        y = jax.lax.conv_general_dilated(
            x, w_hwio, window_strides=(1, 1), padding='SAME',
            dimension_numbers=('NCHW', 'HWIO', 'NCHW'),
            precision=jax.lax.Precision.HIGHEST)
        y = y + b[None, :, None, None]
        mean = jnp.mean(y, axis=(0, 2, 3), keepdims=True)
        var = jnp.mean((y - mean) ** 2, axis=(0, 2, 3), keepdims=True)
        y = (y - mean) * jax.lax.rsqrt(var + BN_EPS) * g[None, :, None, None] \
            + bt[None, :, None, None]
        x = jnp.where(y > 0, y, LEAKY_SLOPE * y)
    return x + res


def init_params(key, input_channels, middle_channels, num_middle_layers):
    """Deterministic synthetic init. Channel plan mirrors BetterNet.__init__."""
    chans = [(input_channels, middle_channels)]
    chans += [(middle_channels, middle_channels)] * num_middle_layers
    params = []
    for (cin, cout) in chans:
        key, kw, kb = jax.random.split(key, 3)
        w = 0.1 * jax.random.normal(kw, (9, cin, cout), jnp.float32)
        b = 0.1 * jax.random.normal(kb, (cout,), jnp.float32)
        gamma = jnp.ones((cout,), jnp.float32)   # nn.BatchNorm2d default init
        beta = jnp.zeros((cout,), jnp.float32)
        params.append((w, b, gamma, beta))
    return params


if __name__ == "__main__":
    # BetterNet(input_channels=8, middle_channels=8, num_middle_layers=2)
    input_channels = 8
    middle_channels = 8
    num_middle_layers = 2

    key = jax.random.PRNGKey(0)
    kx, kp = jax.random.split(key)
    x = jax.random.normal(kx, (2, input_channels, 16, 16), jnp.float32)  # NCHW
    params = init_params(kp, input_channels, middle_channels, num_middle_layers)

    out = jax.block_until_ready(better_net_forward(x, params))
    ref = jax.block_until_ready(reference_forward(x, params))

    assert out.shape == x.shape and out.dtype == jnp.float32
    # Tolerance leaves headroom for MXU matmul-pass rounding of the f32 conv vs. the
    # HIGHEST-precision XLA reference conv, compounded over the stacked layers.
    np.testing.assert_allclose(np.asarray(out), np.asarray(ref), rtol=1e-2, atol=1e-2)
    print("KERNEL_OK")
</pallas_src>

<mosaic_0001>
module attributes {stable_mosaic.version = 11 : i64} {
  func.func @better_net_kernel(%arg0: memref<32x128xf32, #tpu.memory_space<vmem>>, %arg1: memref<2x32x32xf32, #tpu.memory_space<vmem>>, %arg2: memref<9x128x128xf32, #tpu.memory_space<vmem>>, %arg3: memref<128x128xf32, #tpu.memory_space<vmem>>, %arg4: memref<3x1x128xf32, #tpu.memory_space<vmem>>, %arg5: memref<3x1x128xf32, #tpu.memory_space<vmem>>, %arg6: memref<32x128xf32, #tpu.memory_space<vmem>>) attributes {dimension_semantics = [], scalar_prefetch = 0 : i64, scratch_operands = 0 : i64, tpu.core_type = #tpu.core_type<tc>} {
    %c0 = arith.constant 0 : index
    %c0_0 = arith.constant 0 : index
    %0 = vector.load %arg0[%c0, %c0_0] : memref<32x128xf32, #tpu.memory_space<vmem>>, vector<32x128xf32>
    %c0_1 = arith.constant 0 : index
    %c0_2 = arith.constant 0 : index
    %1 = vector.load %arg3[%c0_1, %c0_2] : memref<128x128xf32, #tpu.memory_space<vmem>>, vector<128x128xf32>
    %c0_3 = arith.constant 0 : index
    %c0_4 = arith.constant 0 : index
    %c0_5 = arith.constant 0 : index
    %2 = vector.load %arg1[%c0_3, %c0_4, %c0_5] : memref<2x32x32xf32, #tpu.memory_space<vmem>>, vector<1x32x32xf32>
    %3 = vector.shape_cast %2 : vector<1x32x32xf32> to vector<32x32xf32>
    %c1 = arith.constant 1 : index
    %c0_6 = arith.constant 0 : index
    %c0_7 = arith.constant 0 : index
    %4 = vector.load %arg1[%c1, %c0_6, %c0_7] : memref<2x32x32xf32, #tpu.memory_space<vmem>>, vector<1x32x32xf32>
    %5 = vector.shape_cast %4 : vector<1x32x32xf32> to vector<32x32xf32>
    %cst = arith.constant dense<0.000000e+00> : vector<32x128xf32>
    %6 = tpu.matmul %3, %0, %cst {dimension_numbers = #tpu.dot_dimension_numbers<[1], [0], [0], [1], [0, 0, 1, 1], [], []>} : vector<32x32xf32>, vector<32x128xf32>, vector<32x128xf32> -> vector<32x128xf32>
    %cst_8 = arith.constant dense<0.000000e+00> : vector<32x128xf32>
    %7 = tpu.matmul %5, %0, %cst_8 {dimension_numbers = #tpu.dot_dimension_numbers<[1], [0], [0], [1], [0, 0, 1, 1], [], []>} : vector<32x32xf32>, vector<32x128xf32>, vector<32x128xf32> -> vector<32x128xf32>
    %c0_9 = arith.constant 0 : index
    %c0_10 = arith.constant 0 : index
    %c0_11 = arith.constant 0 : index
    %8 = vector.load %arg2[%c0_9, %c0_10, %c0_11] : memref<9x128x128xf32, #tpu.memory_space<vmem>>, vector<1x128x128xf32>
    %9 = vector.shape_cast %8 : vector<1x128x128xf32> to vector<128x128xf32>
    %cst_12 = arith.constant dense<0.000000e+00> : vector<32x128xf32>
    %10 = tpu.matmul %6, %9, %cst_12 {dimension_numbers = #tpu.dot_dimension_numbers<[1], [0], [0], [1], [0, 0, 1, 1], [], []>} : vector<32x128xf32>, vector<128x128xf32>, vector<32x128xf32> -> vector<32x128xf32>
    %c1_13 = arith.constant 1 : index
    %c0_14 = arith.constant 0 : index
    %c0_15 = arith.constant 0 : index
    %11 = vector.load %arg2[%c1_13, %c0_14, %c0_15] : memref<9x128x128xf32, #tpu.memory_space<vmem>>, vector<1x128x128xf32>
    %12 = vector.shape_cast %11 : vector<1x128x128xf32> to vector<128x128xf32>
    %cst_16 = arith.constant dense<0.000000e+00> : vector<32x128xf32>
    %13 = tpu.matmul %0, %12, %cst_16 {dimension_numbers = #tpu.dot_dimension_numbers<[1], [0], [0], [1], [0, 0, 1, 1], [], []>} : vector<32x128xf32>, vector<128x128xf32>, vector<32x128xf32> -> vector<32x128xf32>
    %14 = arith.addf %10, %13 : vector<32x128xf32>
    %c2 = arith.constant 2 : index
    %c0_17 = arith.constant 0 : index
    %c0_18 = arith.constant 0 : index
    %15 = vector.load %arg2[%c2, %c0_17, %c0_18] : memref<9x128x128xf32, #tpu.memory_space<vmem>>, vector<1x128x128xf32>
    %16 = vector.shape_cast %15 : vector<1x128x128xf32> to vector<128x128xf32>
    %cst_19 = arith.constant dense<0.000000e+00> : vector<32x128xf32>
    %17 = tpu.matmul %7, %16, %cst_19 {dimension_numbers = #tpu.dot_dimension_numbers<[1], [0], [0], [1], [0, 0, 1, 1], [], []>} : vector<32x128xf32>, vector<128x128xf32>, vector<32x128xf32> -> vector<32x128xf32>
    %18 = arith.addf %14, %17 : vector<32x128xf32>
    %cst_20 = arith.constant dense<0.000000e+00> : vector<32x128xf32>
    %19 = tpu.matmul %18, %1, %cst_20 {dimension_numbers = #tpu.dot_dimension_numbers<[1], [0], [0], [1], [0, 0, 1, 1], [], []>} : vector<32x128xf32>, vector<128x128xf32>, vector<32x128xf32> -> vector<32x128xf32>
    %cst_21 = arith.constant dense<0.000000e+00> : vector<128xf32>
    %20 = vector.multi_reduction <add>, %19, %cst_21 [0] : vector<32x128xf32> to vector<128xf32>
    %21 = vector.shape_cast %20 : vector<128xf32> to vector<1x128xf32>
    %cst_22 = arith.constant 0.001953125 : f32
    %22 = vector.broadcast %cst_22 : f32 to vector<1x128xf32>
    %23 = arith.mulf %21, %22 : vector<1x128xf32>
    %24 = vector.broadcast %23 : vector<1x128xf32> to vector<32x128xf32>
    %25 = arith.subf %18, %24 : vector<32x128xf32>
    %26 = arith.mulf %25, %25 : vector<32x128xf32>
    %cst_23 = arith.constant dense<0.000000e+00> : vector<32x128xf32>
    %27 = tpu.matmul %26, %1, %cst_23 {dimension_numbers = #tpu.dot_dimension_numbers<[1], [0], [0], [1], [0, 0, 1, 1], [], []>} : vector<32x128xf32>, vector<128x128xf32>, vector<32x128xf32> -> vector<32x128xf32>
    %cst_24 = arith.constant dense<0.000000e+00> : vector<128xf32>
    %28 = vector.multi_reduction <add>, %27, %cst_24 [0] : vector<32x128xf32> to vector<128xf32>
    %29 = vector.shape_cast %28 : vector<128xf32> to vector<1x128xf32>
    %cst_25 = arith.constant 0.001953125 : f32
    %30 = vector.broadcast %cst_25 : f32 to vector<1x128xf32>
    %31 = arith.mulf %29, %30 : vector<1x128xf32>
    %cst_26 = arith.constant 9.99999974E-6 : f32
    %32 = vector.broadcast %cst_26 : f32 to vector<1x128xf32>
    %33 = arith.addf %31, %32 : vector<1x128xf32>
    %34 = math.rsqrt %33 : vector<1x128xf32>
    %c0_27 = arith.constant 0 : index
    %c0_28 = arith.constant 0 : index
    %c0_29 = arith.constant 0 : index
    %35 = vector.load %arg4[%c0_27, %c0_28, %c0_29] : memref<3x1x128xf32, #tpu.memory_space<vmem>>, vector<1x1x128xf32>
    %36 = vector.shape_cast %35 : vector<1x1x128xf32> to vector<1x128xf32>
    %37 = arith.mulf %34, %36 : vector<1x128xf32>
    %38 = vector.broadcast %37 : vector<1x128xf32> to vector<32x128xf32>
    %39 = arith.mulf %25, %38 : vector<32x128xf32>
    %c0_30 = arith.constant 0 : index
    %c0_31 = arith.constant 0 : index
    %c0_32 = arith.constant 0 : index
    %40 = vector.load %arg5[%c0_30, %c0_31, %c0_32] : memref<3x1x128xf32, #tpu.memory_space<vmem>>, vector<1x1x128xf32>
    %41 = vector.shape_cast %40 : vector<1x1x128xf32> to vector<1x128xf32>
    %42 = vector.broadcast %41 : vector<1x128xf32> to vector<32x128xf32>
    %43 = arith.addf %39, %42 : vector<32x128xf32>
    %cst_33 = arith.constant 0.000000e+00 : f32
    %44 = vector.broadcast %cst_33 : f32 to vector<32x128xf32>
    %45 = arith.cmpf ogt, %43, %44 : vector<32x128xf32>
    %cst_34 = arith.constant 0.00999999977 : f32
    %46 = vector.broadcast %cst_34 : f32 to vector<32x128xf32>
    %47 = arith.mulf %46, %43 : vector<32x128xf32>
    %48 = arith.select %45, %43, %47 : vector<32x128xi1>, vector<32x128xf32>
    %cst_35 = arith.constant dense<0.000000e+00> : vector<32x128xf32>
    %49 = tpu.matmul %3, %48, %cst_35 {dimension_numbers = #tpu.dot_dimension_numbers<[1], [0], [0], [1], [0, 0, 1, 1], [], []>} : vector<32x32xf32>, vector<32x128xf32>, vector<32x128xf32> -> vector<32x128xf32>
    %cst_36 = arith.constant dense<0.000000e+00> : vector<32x128xf32>
    %50 = tpu.matmul %5, %48, %cst_36 {dimension_numbers = #tpu.dot_dimension_numbers<[1], [0], [0], [1], [0, 0, 1, 1], [], []>} : vector<32x32xf32>, vector<32x128xf32>, vector<32x128xf32> -> vector<32x128xf32>
    %c3 = arith.constant 3 : index
    %c0_37 = arith.constant 0 : index
    %c0_38 = arith.constant 0 : index
    %51 = vector.load %arg2[%c3, %c0_37, %c0_38] : memref<9x128x128xf32, #tpu.memory_space<vmem>>, vector<1x128x128xf32>
    %52 = vector.shape_cast %51 : vector<1x128x128xf32> to vector<128x128xf32>
    %cst_39 = arith.constant dense<0.000000e+00> : vector<32x128xf32>
    %53 = tpu.matmul %49, %52, %cst_39 {dimension_numbers = #tpu.dot_dimension_numbers<[1], [0], [0], [1], [0, 0, 1, 1], [], []>} : vector<32x128xf32>, vector<128x128xf32>, vector<32x128xf32> -> vector<32x128xf32>
    %c4 = arith.constant 4 : index
    %c0_40 = arith.constant 0 : index
    %c0_41 = arith.constant 0 : index
    %54 = vector.load %arg2[%c4, %c0_40, %c0_41] : memref<9x128x128xf32, #tpu.memory_space<vmem>>, vector<1x128x128xf32>
    %55 = vector.shape_cast %54 : vector<1x128x128xf32> to vector<128x128xf32>
    %cst_42 = arith.constant dense<0.000000e+00> : vector<32x128xf32>
    %56 = tpu.matmul %48, %55, %cst_42 {dimension_numbers = #tpu.dot_dimension_numbers<[1], [0], [0], [1], [0, 0, 1, 1], [], []>} : vector<32x128xf32>, vector<128x128xf32>, vector<32x128xf32> -> vector<32x128xf32>
    %57 = arith.addf %53, %56 : vector<32x128xf32>
    %c5 = arith.constant 5 : index
    %c0_43 = arith.constant 0 : index
    %c0_44 = arith.constant 0 : index
    %58 = vector.load %arg2[%c5, %c0_43, %c0_44] : memref<9x128x128xf32, #tpu.memory_space<vmem>>, vector<1x128x128xf32>
    %59 = vector.shape_cast %58 : vector<1x128x128xf32> to vector<128x128xf32>
    %cst_45 = arith.constant dense<0.000000e+00> : vector<32x128xf32>
    %60 = tpu.matmul %50, %59, %cst_45 {dimension_numbers = #tpu.dot_dimension_numbers<[1], [0], [0], [1], [0, 0, 1, 1], [], []>} : vector<32x128xf32>, vector<128x128xf32>, vector<32x128xf32> -> vector<32x128xf32>
    %61 = arith.addf %57, %60 : vector<32x128xf32>
    %cst_46 = arith.constant dense<0.000000e+00> : vector<32x128xf32>
    %62 = tpu.matmul %61, %1, %cst_46 {dimension_numbers = #tpu.dot_dimension_numbers<[1], [0], [0], [1], [0, 0, 1, 1], [], []>} : vector<32x128xf32>, vector<128x128xf32>, vector<32x128xf32> -> vector<32x128xf32>
    %cst_47 = arith.constant dense<0.000000e+00> : vector<128xf32>
    %63 = vector.multi_reduction <add>, %62, %cst_47 [0] : vector<32x128xf32> to vector<128xf32>
    %64 = vector.shape_cast %63 : vector<128xf32> to vector<1x128xf32>
    %cst_48 = arith.constant 0.001953125 : f32
    %65 = vector.broadcast %cst_48 : f32 to vector<1x128xf32>
    %66 = arith.mulf %64, %65 : vector<1x128xf32>
    %67 = vector.broadcast %66 : vector<1x128xf32> to vector<32x128xf32>
    %68 = arith.subf %61, %67 : vector<32x128xf32>
    %69 = arith.mulf %68, %68 : vector<32x128xf32>
    %cst_49 = arith.constant dense<0.000000e+00> : vector<32x128xf32>
    %70 = tpu.matmul %69, %1, %cst_49 {dimension_numbers = #tpu.dot_dimension_numbers<[1], [0], [0], [1], [0, 0, 1, 1], [], []>} : vector<32x128xf32>, vector<128x128xf32>, vector<32x128xf32> -> vector<32x128xf32>
    %cst_50 = arith.constant dense<0.000000e+00> : vector<128xf32>
    %71 = vector.multi_reduction <add>, %70, %cst_50 [0] : vector<32x128xf32> to vector<128xf32>
    %72 = vector.shape_cast %71 : vector<128xf32> to vector<1x128xf32>
    %cst_51 = arith.constant 0.001953125 : f32
    %73 = vector.broadcast %cst_51 : f32 to vector<1x128xf32>
    %74 = arith.mulf %72, %73 : vector<1x128xf32>
    %cst_52 = arith.constant 9.99999974E-6 : f32
    %75 = vector.broadcast %cst_52 : f32 to vector<1x128xf32>
    %76 = arith.addf %74, %75 : vector<1x128xf32>
    %77 = math.rsqrt %76 : vector<1x128xf32>
    %c1_53 = arith.constant 1 : index
    %c0_54 = arith.constant 0 : index
    %c0_55 = arith.constant 0 : index
    %78 = vector.load %arg4[%c1_53, %c0_54, %c0_55] : memref<3x1x128xf32, #tpu.memory_space<vmem>>, vector<1x1x128xf32>
    %79 = vector.shape_cast %78 : vector<1x1x128xf32> to vector<1x128xf32>
    %80 = arith.mulf %77, %79 : vector<1x128xf32>
    %81 = vector.broadcast %80 : vector<1x128xf32> to vector<32x128xf32>
    %82 = arith.mulf %68, %81 : vector<32x128xf32>
    %c1_56 = arith.constant 1 : index
    %c0_57 = arith.constant 0 : index
    %c0_58 = arith.constant 0 : index
    %83 = vector.load %arg5[%c1_56, %c0_57, %c0_58] : memref<3x1x128xf32, #tpu.memory_space<vmem>>, vector<1x1x128xf32>
    %84 = vector.shape_cast %83 : vector<1x1x128xf32> to vector<1x128xf32>
    %85 = vector.broadcast %84 : vector<1x128xf32> to vector<32x128xf32>
    %86 = arith.addf %82, %85 : vector<32x128xf32>
    %cst_59 = arith.constant 0.000000e+00 : f32
    %87 = vector.broadcast %cst_59 : f32 to vector<32x128xf32>
    %88 = arith.cmpf ogt, %86, %87 : vector<32x128xf32>
    %cst_60 = arith.constant 0.00999999977 : f32
    %89 = vector.broadcast %cst_60 : f32 to vector<32x128xf32>
    %90 = arith.mulf %89, %86 : vector<32x128xf32>
    %91 = arith.select %88, %86, %90 : vector<32x128xi1>, vector<32x128xf32>
    %cst_61 = arith.constant dense<0.000000e+00> : vector<32x128xf32>
    %92 = tpu.matmul %3, %91, %cst_61 {dimension_numbers = #tpu.dot_dimension_numbers<[1], [0], [0], [1], [0, 0, 1, 1], [], []>} : vector<32x32xf32>, vector<32x128xf32>, vector<32x128xf32> -> vector<32x128xf32>
    %cst_62 = arith.constant dense<0.000000e+00> : vector<32x128xf32>
    %93 = tpu.matmul %5, %91, %cst_62 {dimension_numbers = #tpu.dot_dimension_numbers<[1], [0], [0], [1], [0, 0, 1, 1], [], []>} : vector<32x32xf32>, vector<32x128xf32>, vector<32x128xf32> -> vector<32x128xf32>
    %c6 = arith.constant 6 : index
    %c0_63 = arith.constant 0 : index
    %c0_64 = arith.constant 0 : index
    %94 = vector.load %arg2[%c6, %c0_63, %c0_64] : memref<9x128x128xf32, #tpu.memory_space<vmem>>, vector<1x128x128xf32>
    %95 = vector.shape_cast %94 : vector<1x128x128xf32> to vector<128x128xf32>
    %cst_65 = arith.constant dense<0.000000e+00> : vector<32x128xf32>
    %96 = tpu.matmul %92, %95, %cst_65 {dimension_numbers = #tpu.dot_dimension_numbers<[1], [0], [0], [1], [0, 0, 1, 1], [], []>} : vector<32x128xf32>, vector<128x128xf32>, vector<32x128xf32> -> vector<32x128xf32>
    %c7 = arith.constant 7 : index
    %c0_66 = arith.constant 0 : index
    %c0_67 = arith.constant 0 : index
    %97 = vector.load %arg2[%c7, %c0_66, %c0_67] : memref<9x128x128xf32, #tpu.memory_space<vmem>>, vector<1x128x128xf32>
    %98 = vector.shape_cast %97 : vector<1x128x128xf32> to vector<128x128xf32>
    %cst_68 = arith.constant dense<0.000000e+00> : vector<32x128xf32>
    %99 = tpu.matmul %91, %98, %cst_68 {dimension_numbers = #tpu.dot_dimension_numbers<[1], [0], [0], [1], [0, 0, 1, 1], [], []>} : vector<32x128xf32>, vector<128x128xf32>, vector<32x128xf32> -> vector<32x128xf32>
    %100 = arith.addf %96, %99 : vector<32x128xf32>
    %c8 = arith.constant 8 : index
    %c0_69 = arith.constant 0 : index
    %c0_70 = arith.constant 0 : index
    %101 = vector.load %arg2[%c8, %c0_69, %c0_70] : memref<9x128x128xf32, #tpu.memory_space<vmem>>, vector<1x128x128xf32>
    %102 = vector.shape_cast %101 : vector<1x128x128xf32> to vector<128x128xf32>
    %cst_71 = arith.constant dense<0.000000e+00> : vector<32x128xf32>
    %103 = tpu.matmul %93, %102, %cst_71 {dimension_numbers = #tpu.dot_dimension_numbers<[1], [0], [0], [1], [0, 0, 1, 1], [], []>} : vector<32x128xf32>, vector<128x128xf32>, vector<32x128xf32> -> vector<32x128xf32>
    %104 = arith.addf %100, %103 : vector<32x128xf32>
    %cst_72 = arith.constant dense<0.000000e+00> : vector<32x128xf32>
    %105 = tpu.matmul %104, %1, %cst_72 {dimension_numbers = #tpu.dot_dimension_numbers<[1], [0], [0], [1], [0, 0, 1, 1], [], []>} : vector<32x128xf32>, vector<128x128xf32>, vector<32x128xf32> -> vector<32x128xf32>
    %cst_73 = arith.constant dense<0.000000e+00> : vector<128xf32>
    %106 = vector.multi_reduction <add>, %105, %cst_73 [0] : vector<32x128xf32> to vector<128xf32>
    %107 = vector.shape_cast %106 : vector<128xf32> to vector<1x128xf32>
    %cst_74 = arith.constant 0.001953125 : f32
    %108 = vector.broadcast %cst_74 : f32 to vector<1x128xf32>
    %109 = arith.mulf %107, %108 : vector<1x128xf32>
    %110 = vector.broadcast %109 : vector<1x128xf32> to vector<32x128xf32>
    %111 = arith.subf %104, %110 : vector<32x128xf32>
    %112 = arith.mulf %111, %111 : vector<32x128xf32>
    %cst_75 = arith.constant dense<0.000000e+00> : vector<32x128xf32>
    %113 = tpu.matmul %112, %1, %cst_75 {dimension_numbers = #tpu.dot_dimension_numbers<[1], [0], [0], [1], [0, 0, 1, 1], [], []>} : vector<32x128xf32>, vector<128x128xf32>, vector<32x128xf32> -> vector<32x128xf32>
    %cst_76 = arith.constant dense<0.000000e+00> : vector<128xf32>
    %114 = vector.multi_reduction <add>, %113, %cst_76 [0] : vector<32x128xf32> to vector<128xf32>
    %115 = vector.shape_cast %114 : vector<128xf32> to vector<1x128xf32>
    %cst_77 = arith.constant 0.001953125 : f32
    %116 = vector.broadcast %cst_77 : f32 to vector<1x128xf32>
    %117 = arith.mulf %115, %116 : vector<1x128xf32>
    %cst_78 = arith.constant 9.99999974E-6 : f32
    %118 = vector.broadcast %cst_78 : f32 to vector<1x128xf32>
    %119 = arith.addf %117, %118 : vector<1x128xf32>
    %120 = math.rsqrt %119 : vector<1x128xf32>
    %c2_79 = arith.constant 2 : index
    %c0_80 = arith.constant 0 : index
    %c0_81 = arith.constant 0 : index
    %121 = vector.load %arg4[%c2_79, %c0_80, %c0_81] : memref<3x1x128xf32, #tpu.memory_space<vmem>>, vector<1x1x128xf32>
    %122 = vector.shape_cast %121 : vector<1x1x128xf32> to vector<1x128xf32>
    %123 = arith.mulf %120, %122 : vector<1x128xf32>
    %124 = vector.broadcast %123 : vector<1x128xf32> to vector<32x128xf32>
    %125 = arith.mulf %111, %124 : vector<32x128xf32>
    %c2_82 = arith.constant 2 : index
    %c0_83 = arith.constant 0 : index
    %c0_84 = arith.constant 0 : index
    %126 = vector.load %arg5[%c2_82, %c0_83, %c0_84] : memref<3x1x128xf32, #tpu.memory_space<vmem>>, vector<1x1x128xf32>
    %127 = vector.shape_cast %126 : vector<1x1x128xf32> to vector<1x128xf32>
    %128 = vector.broadcast %127 : vector<1x128xf32> to vector<32x128xf32>
    %129 = arith.addf %125, %128 : vector<32x128xf32>
    %cst_85 = arith.constant 0.000000e+00 : f32
    %130 = vector.broadcast %cst_85 : f32 to vector<32x128xf32>
    %131 = arith.cmpf ogt, %129, %130 : vector<32x128xf32>
    %cst_86 = arith.constant 0.00999999977 : f32
    %132 = vector.broadcast %cst_86 : f32 to vector<32x128xf32>
    %133 = arith.mulf %132, %129 : vector<32x128xf32>
    %134 = arith.select %131, %129, %133 : vector<32x128xi1>, vector<32x128xf32>
    %135 = arith.addf %134, %0 : vector<32x128xf32>
    %c0_87 = arith.constant 0 : index
    %c0_88 = arith.constant 0 : index
    %136 = vector.load %arg6[%c0_87, %c0_88] : memref<32x128xf32, #tpu.memory_space<vmem>>, vector<32x128xf32>
    tpu.vector_store %arg6[%c0_87, %c0_88], %135 {strides = array<i32>} : memref<32x128xf32, #tpu.memory_space<vmem>>, vector<32x128xf32>,
    return
  }
}

</mosaic_0001>

<bundles_post_ra>
// kernel: tpu_custom_call.1
= control target key start
LH: loop header
LB: loop body
LE: loop exit
PB: predicated region body
PF: predicated region fallthrough
CT: control target
= control target key end

     0   :  { %11 = vsyncpa [#allocation3], 0  ;;  %s1744_s0 = inlined_call_operand.hbm [shape: f32[32,128], index: 0, kind: input, shape index: {}]   ;;  %s1745_s1 = inlined_call_operand.hbm [shape: f32[2,32,32], index: 1, kind: input, shape index: {}]   ;;  %s1746_s2 = inlined_call_operand.hbm [shape: f32[9,128,128], index: 2, kind: input, shape index: {}]   ;;  %s1747_s3 = inlined_call_operand.hbm [shape: f32[128,128], index: 3, kind: input, shape index: {}]   ;;  %s1748_s4 = inlined_call_operand.vmem [shape: f32[3,1,128], index: 4, kind: input, shape index: {}]   ;;  %s1749_s5 = inlined_call_operand.hbm [shape: f32[3,1,128], index: 5, kind: input, shape index: {}]   ;;  %s1750_s6 = inlined_call_operand.hbm [shape: f32[32,128], index: 6, kind: output, shape index: {}]  }
   0x1   :  { %12 = vsyncpa [#allocation6], 0 }
   0x2   :  { %13 = vsyncpa [#allocation9], 0 }
   0x3   :  { %14 = vsyncpa [#allocation4], 0  ;;  %s32_s23 = sshll.u32 %s1745_s1, 4  ;;  %s1401_s24 = smov [#allocation5]   ;;  %s33_s23 = int_to_ptr.hbm [resolvable:$true] %s32_s23 }
   0x4   :  { %s34_s25 = sshll.u32 %s1401_s24, 4  ;;  %s58_s28 = sshll.u32 %s1747_s3, 4  ;;  %s35_s25 = int_to_ptr.vmem [resolvable:$true] %s34_s25  ;;  %s59_s28 = int_to_ptr.hbm [resolvable:$true] %s58_s28 }
   0x5   :  { %s1402_s29 = smov 128   ;;  %s1403_s30 = smov 8  }
   0x6   :  { %40 = dma.hbm_to_vmem [thread:$0]  %s33_s23, 1024, %s35_s25, [#allocation6], %s1402_s29, %s1402_s29, %s1403_s30  }
   0x7   :  { %s1404_s7 = smov [#allocation8]   ;;  %s19_s1 = sshll.u32 %s1744_s0, 4  ;;  %s20_s1 = int_to_ptr.hbm [resolvable:$true] %s19_s1 }
   0x8   :  { %s60_s8 = sshll.u32 %s1404_s7, 4  ;;  %s45_s12 = sshll.u32 %s1746_s2, 4  ;;  %s61_s8 = int_to_ptr.vmem [resolvable:$true] %s60_s8  ;;  %s46_s12 = int_to_ptr.hbm [resolvable:$true] %s45_s12 }
   0x9   :  { %66 = dma.hbm_to_vmem [thread:$0]  %s59_s28, 2048, %s61_s8, [#allocation9], %s1402_s29, %s1402_s29, %s1403_s30  }
   0xa   :  { %s1405_s13 = smov [#allocation2]   ;;  %s1406_s15 = smov [#allocation7]  }
   0xb   :  { %s21_s14 = sshll.u32 %s1405_s13, 4  ;;  %s47_s0 = sshll.u32 %s1406_s15, 4  ;;  %s22_s14 = int_to_ptr.vmem [resolvable:$true] %s21_s14  ;;  %s48_s0 = int_to_ptr.vmem [resolvable:$true] %s47_s0 }
   0xc   :  { %27 = dma.hbm_to_vmem [thread:$0]  %s20_s1, 512, %s22_s14, [#allocation3], %s1402_s29, %s1402_s29, %s1403_s30  }
   0xd   :  { %s73_s18 = sshll.u32 %s1749_s5, 4  ;;  %s1407_s2 = smov [#allocation10]   ;;  %s74_s18 = int_to_ptr.hbm [resolvable:$true] %s73_s18 }
   0xe   :  { %53 = dma.hbm_to_vmem [thread:$0]  %s46_s12, 18432, %s48_s0, [#allocation6], %s1402_s29, %s1402_s29, %s1403_s30  }
   0xf   :  { %s75_s19 = sshll.u32 %s1407_s2, 4  ;;  %s1408_s20 = smov 16   ;;  %s76_s19 = int_to_ptr.vmem [resolvable:$true] %s75_s19 }
  0x10   :  { %s1409_s21 = smov 1  }
  0x11   :  { %81 = dma.hbm_to_vmem [thread:$0]  %s74_s18, 48, %s76_s19, [#allocation9], %s1408_s20, %s1408_s20, %s1409_s21  }
  0x12   :  { %1393 = dma.done.wait [#allocation3], 512  }
  0x13   :  { %1394 = vsyncadd [#allocation3], 4294966784 }
  0x14   :  { %1395 = dma.done.wait [#allocation6], 19456  }
  0x15   :  { %1396 = vsyncadd [#allocation6], 4294947840 }
  0x16   :  { %1397 = dma.done.wait [#allocation9], 2096  }
  0x17   :  { %1398 = vsyncadd [#allocation9], 4294965200  ;;  %v1473_v0 = vld [vmem:[#allocation2 + $0x18] sm:$0xff]  ;;  %v1475_v1 = vld [vmem:[#allocation2 + $0x10] sm:$0xff]  ;;  %vm131_vm0 = vcmask 261120   ;;  %s1145_s8 = sshll.u32 %s1750_s6, 4  ;;  %s1146_s8 = int_to_ptr.hbm [resolvable:$true] %s1145_s8 }
  0x18   :  { %156 = vmatpush.msra.mxu0 %v1473_v0  ;;  %197 = vmatpush.msra.mxu1 %v1473_v0  ;;  %v1479_v2 = vld [vmem:[#allocation2 + $0x8] sm:$0xff]  ;;  %v1483_v3 = vld [vmem:[#allocation2] sm:$0xff]  ;;  %v246_v4 = vld [vmem:[#allocation7 + $0xf8] sm:$0xff] }
  0x19   :  { %v229_v5 = vld [vmem:[#allocation7 + $0x78] sm:$0xff]  ;;  %v1486_v6 = vld [vmem:[#allocation5] sm:$0xff]  ;;  %247 = vmatpush.msra.mxu2 %v246_v4  ;;  %v245_v8 = vld [vmem:[#allocation7 + $0xf0] sm:$0xff] }
  0x1a   :  { %157 = vmatpush.msra.mxu0 %v1475_v1  ;;  %198 = vmatpush.msra.mxu1 %v1475_v1  ;;  %v1489_v7 = vld [vmem:[#allocation5 + $0x20] sm:$0xff]  ;;  %v228_v9 = vld [vmem:[#allocation7 + $0x70] sm:$0xff]  ;;  %v321_v10 = vld [vmem:[#allocation7 + $0x178] sm:$0xff] }
  0x1b   :  { %276 = vmatpush.msra.mxu3 %v229_v5  ;;  %v244_v11 = vld [vmem:[#allocation7 + $0xe8] sm:$0xff]  ;;  %248 = vmatpush.msra.mxu2 %v245_v8  ;;  %v320_v13 = vld [vmem:[#allocation7 + $0x170] sm:$0xff]  ;;  %v243_v14 = vld [vmem:[#allocation7 + $0xe0] sm:$0xff] }
  0x1c   :  { %158 = vmatpush.msra.mxu0 %v1479_v2  ;;  %199 = vmatpush.msra.mxu1 %v1479_v2  ;;  %v227_v12 = vld [vmem:[#allocation7 + $0x68] sm:$0xff]  ;;  %v226_v15 = vld [vmem:[#allocation7 + $0x60] sm:$0xff]  ;;  %v242_v17 = vld [vmem:[#allocation7 + $0xd8] sm:$0xff] }
  0x1d   :  { %277 = vmatpush.msra.mxu3 %v228_v9  ;;  %249 = vmatpush.msra.mxu2 %v244_v11  ;;  %v319_v16 = vld [vmem:[#allocation7 + $0x168] sm:$0xff]  ;;  %v225_v18 = vld [vmem:[#allocation7 + $0x58] sm:$0xff]  ;;  %v241_v21 = vld [vmem:[#allocation7 + $0xd0] sm:$0xff] }
  0x1e   :  { %159 = vmatpush.msra.mxu0 %v1483_v3  ;;  %200 = vmatpush.msra.mxu1 %v1483_v3  ;;  %v1497_v19 = vld [vmem:[#allocation5 + $0x8] sm:$0xff]  ;;  %v224_v22 = vld [vmem:[#allocation7 + $0x50] sm:$0xff]  ;;  %v318_v23 = vld [vmem:[#allocation7 + $0x160] sm:$0xff] }
  0x1f   :  { %1160 = vmatmul.msk.f32.vlgmr.msra.gmra.mxu0 %vm131_vm0, %v1486_v6  ;;  %1164 = vmatmul.msk.f32.vlgmr.msra.gmra.mxu1 %vm131_vm0, %v1489_v7  ;;  %v1499_v20 = vld [vmem:[#allocation5 + $0x28] sm:$0xff]  ;;  %v239_v26 = vld [vmem:[#allocation7 + $0xc0] sm:$0xff]  ;;  %v317_v27 = vld [vmem:[#allocation7 + $0x158] sm:$0xff] }
  0x20   :  { %322 = vmatpush.msrb.mxu0 %v321_v10  ;;  %278 = vmatpush.msra.mxu3 %v227_v12  ;;  %v240_v24 = vld [vmem:[#allocation7 + $0xc8] sm:$0xff]  ;;  %v222_v28 = vld [vmem:[#allocation7 + $0x40] sm:$0xff]  ;;  %v316_v29 = vld [vmem:[#allocation7 + $0x150] sm:$0xff] }
  0x21   :  { %250 = vmatpush.msra.mxu2 %v243_v14  ;;  %v223_v25 = vld [vmem:[#allocation7 + $0x48] sm:$0xff]  ;;  %v238_v30 = vld [vmem:[#allocation7 + $0xb8] sm:$0xff]  ;;  %v1505_v32 = vld [vmem:[#allocation5 + $0x10] sm:$0xff] }
  0x22   :  { %323 = vmatpush.msrb.mxu0 %v320_v13  ;;  %279 = vmatpush.msra.mxu3 %v226_v15  ;;  %v221_v31 = vld [vmem:[#allocation7 + $0x38] sm:$0xff]  ;;  %v1507_v33 = vld [vmem:[#allocation5 + $0x30] sm:$0xff]  ;;  %v315_v36 = vld [vmem:[#allocation7 + $0x148] sm:$0xff] }
  0x23   :  { %251 = vmatpush.msra.mxu2 %v242_v17  ;;  %v237_v34 = vld [vmem:[#allocation7 + $0xb0] sm:$0xff]  ;;  %v236_v37 = vld [vmem:[#allocation7 + $0xa8] sm:$0xff]  ;;  %v314_v39 = vld [vmem:[#allocation7 + $0x140] sm:$0xff] }
  0x24   :  { %324 = vmatpush.msrb.mxu0 %v319_v16  ;;  %280 = vmatpush.msra.mxu3 %v225_v18  ;;  %v220_v35 = vld [vmem:[#allocation7 + $0x30] sm:$0xff]  ;;  %v219_v38 = vld [vmem:[#allocation7 + $0x28] sm:$0xff]  ;;  %v235_v40 = vld [vmem:[#allocation7 + $0xa0] sm:$0xff] }
  0x25   :  { %252 = vmatpush.msra.mxu2 %v241_v21  ;;  %v218_v41 = vld [vmem:[#allocation7 + $0x20] sm:$0xff]  ;;  %v313_v42 = vld [vmem:[#allocation7 + $0x138] sm:$0xff]  ;;  %v233_v47 = vld [vmem:[#allocation7 + $0x90] sm:$0xff] }
  0x26   :  { %281 = vmatpush.msra.mxu3 %v224_v22  ;;  %325 = vmatpush.msrb.mxu0 %v318_v23  ;;  %v234_v43 = vld [vmem:[#allocation7 + $0x98] sm:$0xff]  ;;  %v216_v48 = vld [vmem:[#allocation7 + $0x10] sm:$0xff]  ;;  %v232_v50 = vld [vmem:[#allocation7 + $0x88] sm:$0xff] }
  0x27   :  { %1161 = vmatmul.msk.f32.gmra.mxu0 %vm131_vm0, %v1497_v19  ;;  %1165 = vmatmul.msk.f32.gmra.mxu1 %vm131_vm0, %v1499_v20  ;;  %v217_v44 = vld [vmem:[#allocation7 + $0x18] sm:$0xff]  ;;  %v312_v49 = vld [vmem:[#allocation7 + $0x130] sm:$0xff]  ;;  %v215_v51 = vld [vmem:[#allocation7 + $0x8] sm:$0xff] }
  0x28   :  { %253 = vmatpush.msra.mxu2 %v240_v24  ;;  %282 = vmatpush.msra.mxu3 %v223_v25  ;;  %v1513_v45 = vld [vmem:[#allocation5 + $0x18] sm:$0xff]  ;;  %v311_v52 = vld [vmem:[#allocation7 + $0x128] sm:$0xff]  ;;  %v231_v53 = vld [vmem:[#allocation7 + $0x80] sm:$0xff] }
  0x29   :  { %326 = vmatpush.msrb.mxu0 %v317_v27  ;;  %v1515_v46 = vld [vmem:[#allocation5 + $0x38] sm:$0xff]  ;;  %v214_v54 = vld [vmem:[#allocation7] sm:$0xff]  ;;  %v308_v57 = vld [vmem:[#allocation7 + $0x110] sm:$0xff] }
  0x2a   :  { %254 = vmatpush.msra.mxu2 %v239_v26  ;;  %283 = vmatpush.msra.mxu3 %v222_v28  ;;  %v310_v55 = vld [vmem:[#allocation7 + $0x120] sm:$0xff]  ;;  %v309_v56 = vld [vmem:[#allocation7 + $0x118] sm:$0xff]  ;;  %v307_v58 = vld [vmem:[#allocation7 + $0x108] sm:$0xff] }
  0x2b   :  { %327 = vmatpush.msrb.mxu0 %v316_v29  ;;  %v306_v59 = vld [vmem:[#allocation7 + $0x100] sm:$0xff]  ;;  %v1525_v60 = vld [vmem:[#allocation8 + $0x78] sm:$0xff]  ;;  %v1527_v61 = vld [vmem:[#allocation8 + $0x70] sm:$0xff] }
  0x2c   :  { %255 = vmatpush.msra.mxu2 %v238_v30  ;;  %284 = vmatpush.msra.mxu3 %v221_v31  ;;  %v1531_v62 = vld [vmem:[#allocation8 + $0x68] sm:$0xff]  ;;  %v1535_v63 = vld [vmem:[#allocation8 + $0x60] sm:$0xff]  ;;  %v1555_v8 = vld [vmem:[#allocation8 + $0x38] sm:$0xff] }
  0x2d   :  { %328 = vmatpush.msrb.mxu0 %v315_v36  ;;  %355 = vmatpush.msrb.mxu1 %v1525_v60  ;;  %v1547_v4 = vld [vmem:[#allocation8 + $0x48] sm:$0xff]  ;;  %v1551_v5 = vld [vmem:[#allocation8 + $0x40] sm:$0xff]  ;;  %v1559_v11 = vld [vmem:[#allocation8 + $0x30] sm:$0xff] }
  0x2e   :  { %256 = vmatpush.msra.mxu2 %v237_v34  ;;  %285 = vmatpush.msra.mxu3 %v220_v35  ;;  %v1563_v12 = vld [vmem:[#allocation8 + $0x28] sm:$0xff]  ;;  %v1567_v13 = vld [vmem:[#allocation8 + $0x20] sm:$0xff]  ;;  %v1571_v14 = vld [vmem:[#allocation8 + $0x18] sm:$0xff] }
  0x2f   :  { %1162 = vmatmul.msk.f32.gmra.mxu0 %vm131_vm0, %v1505_v32  ;;  %1166 = vmatmul.msk.f32.gmra.mxu1 %vm131_vm0, %v1507_v33  ;;  %v1577_v21 = vld [vmem:[#allocation8 + $0x10] sm:$0xff]  ;;  %v1581_v22 = vld [vmem:[#allocation8 + $0x8] sm:$0xff]  ;;  %v1585_v23 = vld [vmem:[#allocation8] sm:$0xff] }
  0x30   :  { %257 = vmatpush.msra.mxu2 %v236_v37  ;;  %286 = vmatpush.msra.mxu3 %v219_v38 }
  0x31   :  { %329 = vmatpush.msrb.mxu0 %v314_v39  ;;  %356 = vmatpush.msrb.mxu1 %v1527_v61 }
  0x32   :  { %258 = vmatpush.msra.mxu2 %v235_v40  ;;  %287 = vmatpush.msra.mxu3 %v218_v41 }
  0x33   :  { %330 = vmatpush.msrb.mxu0 %v313_v42  ;;  %357 = vmatpush.msrb.mxu1 %v1531_v62 }
  0x34   :  { %259 = vmatpush.msra.mxu2 %v234_v43  ;;  %288 = vmatpush.msra.mxu3 %v217_v44 }
  0x35   :  { %331 = vmatpush.msrb.mxu0 %v312_v49  ;;  %358 = vmatpush.msrb.mxu1 %v1535_v63 }
  0x36   :  { %260 = vmatpush.msra.mxu2 %v233_v47  ;;  %289 = vmatpush.msra.mxu3 %v216_v48 }
  0x37   :  { %1163 = vmatmul.msk.f32.gmra.mxu0 %vm131_vm0, %v1513_v45  ;;  %1167 = vmatmul.msk.f32.gmra.mxu1 %vm131_vm0, %v1515_v46 }
  0x38   :  { %261 = vmatpush.msra.mxu2 %v232_v50  ;;  %290 = vmatpush.msra.mxu3 %v215_v51 }
  0x39   :  { %332 = vmatpush.msrb.mxu0 %v311_v52 }
  0x3a   :  { %262 = vmatpush.msra.mxu2 %v231_v53  ;;  %291 = vmatpush.msra.mxu3 %v214_v54 }
  0x3b   :  { %333 = vmatpush.msrb.mxu0 %v310_v55  ;;  %263 = vmatmul.f32.vlgmr.msra.gmra.mxu2 %v1483_v3  ;;  %v1543_v3 = vld [vmem:[#allocation8 + $0x50] sm:$0xff] }
  0x3c   :  { %402 = vmatpush.msrb.mxu2 %v1525_v60 }
  0x3d   :  { %334 = vmatpush.msrb.mxu0 %v309_v56 }
  0x3e   :  { %403 = vmatpush.msrb.mxu2 %v1527_v61 }
  0x3f   :  { %335 = vmatpush.msrb.mxu0 %v308_v57 }
  0x40   :  { %404 = vmatpush.msrb.mxu2 %v1531_v62 }
  0x41   :  { %336 = vmatpush.msrb.mxu0 %v307_v58 }
  0x42   :  { %405 = vmatpush.msrb.mxu2 %v1535_v63 }
  0x43   :  { %337 = vmatpush.msrb.mxu0 %v306_v59  ;;  %266 = vmatmul.f32.gmra.mxu2 %v1479_v2 }
  0x4b   :  { %269 = vmatmul.f32.gmra.mxu2 %v1475_v1 }
  0x53   :  { %272 = vmatmul.f32.gmra.mxu2 %v1473_v0  ;;  %v1539_v0 = vld [vmem:[#allocation8 + $0x58] sm:$0xff] }
  0x54   :  { %359 = vmatpush.msrb.mxu1 %v1539_v0  ;;  %406 = vmatpush.msrb.mxu2 %v1539_v0 }
  0x56   :  { %360 = vmatpush.msrb.mxu1 %v1543_v3  ;;  %407 = vmatpush.msrb.mxu2 %v1543_v3 }
  0x58   :  { %361 = vmatpush.msrb.mxu1 %v1547_v4  ;;  %408 = vmatpush.msrb.mxu2 %v1547_v4 }
  0x5a   :  { %362 = vmatpush.msrb.mxu1 %v1551_v5  ;;  %409 = vmatpush.msrb.mxu2 %v1551_v5 }
  0x5c   :  { %363 = vmatpush.msrb.mxu1 %v1555_v8  ;;  %410 = vmatpush.msrb.mxu2 %v1555_v8 }
  0x5e   :  { %364 = vmatpush.msrb.mxu1 %v1559_v11  ;;  %411 = vmatpush.msrb.mxu2 %v1559_v11 }
  0x60   :  { %365 = vmatpush.msrb.mxu1 %v1563_v12  ;;  %412 = vmatpush.msrb.mxu2 %v1563_v12 }
  0x62   :  { %366 = vmatpush.msrb.mxu1 %v1567_v13  ;;  %413 = vmatpush.msrb.mxu2 %v1567_v13 }
  0x64   :  { %367 = vmatpush.msrb.mxu1 %v1571_v14  ;;  %414 = vmatpush.msrb.mxu2 %v1571_v14 }
  0x66   :  { %368 = vmatpush.msrb.mxu1 %v1577_v21  ;;  %415 = vmatpush.msrb.mxu2 %v1577_v21 }
  0x68   :  { %369 = vmatpush.msrb.mxu1 %v1581_v22  ;;  %416 = vmatpush.msrb.mxu2 %v1581_v22 }
  0x6a   :  { %370 = vmatpush.msrb.mxu1 %v1585_v23  ;;  %417 = vmatpush.msrb.mxu2 %v1585_v23 }
  0x9c   :  { %v161_v1 = vpop.f32.mrf.mxu0  ;;  %v202_v2 = vpop.f32.mrf.mxu1 }
  0x9d   :  { %292 = vmatmul.f32.vlgmr.msra.gmra.mxu3 %v161_v1  ;;  %338 = vmatmul.f32.vlgmr.msrb.gmra.mxu0 %v202_v2 }
  0xa4   :  { %v164_v9 = vpop.f32.mrf.mxu0  ;;  %v205_v10 = vpop.f32.mrf.mxu1 }
  0xa5   :  { %295 = vmatmul.f32.gmra.mxu3 %v164_v9  ;;  %341 = vmatmul.f32.gmra.mxu0 %v205_v10 }
  0xac   :  { %v167_v15 = vpop.f32.mrf.mxu0  ;;  %v208_v16 = vpop.f32.mrf.mxu1 }
  0xad   :  { %298 = vmatmul.f32.gmra.mxu3 %v167_v15  ;;  %344 = vmatmul.f32.gmra.mxu0 %v208_v16 }
  0xb4   :  { %v170_v17 = vpop.f32.mrf.mxu0  ;;  %v211_v18 = vpop.f32.mrf.mxu1 }
  0xb5   :  { %301 = vmatmul.f32.gmra.mxu3 %v170_v17  ;;  %347 = vmatmul.f32.gmra.mxu0 %v211_v18 }
  0xbe   :  { %v264_v24 = vpop.f32.mrf.mxu2 }
  0xc6   :  { %v267_v28 = vpop.f32.mrf.mxu2 }
  0xce   :  { %v270_v36 = vpop.f32.mrf.mxu2 }
  0xd6   :  { %v273_v41 = vpop.f32.mrf.mxu2 }
 0x11a   :  { %v339_v25 = vpop.f32.mrf.mxu0 }
 0x120   :  { %v293_v26 = vpop.f32.mrf.mxu3 }
 0x121   :  { %v294_v27 = vadd.f32 %v293_v26, %v264_v24 }
 0x122   :  { %v342_v30 = vpop.f32.mrf.mxu0 }
 0x123   :  { %v351_v29 = vadd.f32 %v339_v25, %v294_v27 }
 0x125   :  { %371 = vmatmul.f32.vlgmr.msrb.gmra.mxu1 %v351_v29 }
 0x128   :  { %v296_v31 = vpop.f32.mrf.mxu3 }
 0x129   :  { %v297_v34 = vadd.f32 %v296_v31, %v267_v28  ;;  %v570_v28 = vld [vmem:[#allocation7 + $0x278] sm:$0xff]  ;;  %v567_v31 = vld [vmem:[#allocation7 + $0x260] sm:$0xff] }
 0x12a   :  { %v345_v37 = vpop.f32.mrf.mxu0  ;;  %571 = vmatpush.msra.mxu1 %v570_v28 }
 0x12b   :  { %v352_v35 = vadd.f32 %v342_v30, %v297_v34  ;;  %v568_v30 = vld [vmem:[#allocation7 + $0x268] sm:$0xff] }
 0x12d   :  { %374 = vmatmul.f32.gmra.mxu1 %v352_v35 }
 0x130   :  { %v299_v38 = vpop.f32.mrf.mxu3 }
 0x131   :  { %v300_v39 = vadd.f32 %v299_v38, %v270_v36  ;;  %v565_v36 = vld [vmem:[#allocation7 + $0x250] sm:$0xff] }
 0x132   :  { %v348_v43 = vpop.f32.mrf.mxu0 }
 0x133   :  { %v353_v40 = vadd.f32 %v345_v37, %v300_v39  ;;  %v564_v37 = vld [vmem:[#allocation7 + $0x248] sm:$0xff]  ;;  %v563_v39 = vld [vmem:[#allocation7 + $0x240] sm:$0xff] }
 0x135   :  { %377 = vmatmul.f32.gmra.mxu1 %v353_v40 }
 0x138   :  { %v302_v42 = vpop.f32.mrf.mxu3 }
 0x139   :  { %v303_v44 = vadd.f32 %v302_v42, %v273_v41  ;;  %v562_v42 = vld [vmem:[#allocation7 + $0x238] sm:$0xff] }
 0x13b   :  { %v354_v47 = vadd.f32 %v348_v43, %v303_v44  ;;  %v561_v44 = vld [vmem:[#allocation7 + $0x230] sm:$0xff] }
 0x13d   :  { %380 = vmatmul.f32.gmra.mxu1 %v354_v47 }
 0x1a2   :  { %v372_v48 = vpop.f32.mrf.mxu1 }
 0x1aa   :  { %v375_v49 = vpop.f32.mrf.mxu1 }
 0x1ab   :  { %v384_v51 = vadd.f32 %v375_v49, %v372_v48  ;;  %v560_v48 = vld [vmem:[#allocation7 + $0x228] sm:$0xff] }
 0x1b2   :  { %v378_v50 = vpop.f32.mrf.mxu1 }
 0x1b3   :  { %v385_v52 = vadd.f32 %v384_v51, %v378_v50  ;;  %v559_v50 = vld [vmem:[#allocation7 + $0x220] sm:$0xff]  ;;  %v558_v51 = vld [vmem:[#allocation7 + $0x218] sm:$0xff] }
 0x1ba   :  { %v381_v53 = vpop.f32.mrf.mxu1 }
 0x1bb   :  { %v386_v54 = vadd.f32 %v385_v52, %v381_v53  ;;  %v557_v53 = vld [vmem:[#allocation7 + $0x210] sm:$0xff] }
 0x1bd   :  { %v387_v55 = vrot.slane %v386_v54, 4 }
 0x1bf   :  { %v388_v56 = vadd.f32 %v387_v55, %v386_v54  ;;  %v556_v55 = vld [vmem:[#allocation7 + $0x208] sm:$0xff] }
 0x1c1   :  { %v389_v57 = vrot.slane %v388_v56, 2 }
 0x1c3   :  { %v390_v58 = vadd.f32 %v389_v57, %v388_v56  ;;  %v555_v57 = vld [vmem:[#allocation7 + $0x200] sm:$0xff] }
 0x1c5   :  { %v391_v59 = vrot.slane %v390_v58, 1 }
 0x1c7   :  { %v392_v1 = vadd.f32 %v391_v59, %v390_v58 }
 0x1c9   :  { %v393_v2 = vmul.f32 0.001953125, %v392_v1 }
 0x1cb   :  { %v1589_v9 = vsub.f32 %v351_v29, %v393_v2  ;;  %v1593_v15 = vsub.f32 %v352_v35, %v393_v2  ;;  %v1597_v17 = vsub.f32 %v353_v40, %v393_v2  ;;  %v1601_v24 = vsub.f32 %v354_v47, %v393_v2  ;;  %v569_v29 = vld [vmem:[#allocation7 + $0x270] sm:$0xff]  ;;  %v566_v35 = vld [vmem:[#allocation7 + $0x258] sm:$0xff] }
 0x1cc   :  { %572 = vmatpush.msra.mxu1 %v569_v29 }
 0x1cd   :  { %v398_v10 = vmul.f32 %v1589_v9, %v1589_v9  ;;  %v399_v16 = vmul.f32 %v1593_v15, %v1593_v15  ;;  %v400_v18 = vmul.f32 %v1597_v17, %v1597_v17  ;;  %v401_v25 = vmul.f32 %v1601_v24, %v1601_v24 }
 0x1ce   :  { %573 = vmatpush.msra.mxu1 %v568_v30 }
 0x1cf   :  { %418 = vmatmul.f32.vlgmr.msrb.gmra.mxu2 %v398_v10 }
 0x1d0   :  { %574 = vmatpush.msra.mxu1 %v567_v31  ;;  %v1212_v31 = vld [vmem:[#allocation10] ss:$0 sm:$0xff] }
 0x1d2   :  { %575 = vmatpush.msra.mxu1 %v566_v35 }
 0x1d4   :  { %576 = vmatpush.msra.mxu1 %v565_v36 }
 0x1d6   :  { %577 = vmatpush.msra.mxu1 %v564_v37 }
 0x1d7   :  { %421 = vmatmul.f32.gmra.mxu2 %v399_v16 }
 0x1d8   :  { %578 = vmatpush.msra.mxu1 %v563_v39 }
 0x1da   :  { %579 = vmatpush.msra.mxu1 %v562_v42 }
 0x1dc   :  { %580 = vmatpush.msra.mxu1 %v561_v44  ;;  %v553_v44 = vld [vmem:[#allocation7 + $0x1f8] sm:$0xff] }
 0x1dd   :  { %600 = vmatpush.msra.mxu2 %v553_v44 }
 0x1de   :  { %581 = vmatpush.msra.mxu1 %v560_v48 }
 0x1df   :  { %424 = vmatmul.f32.gmra.mxu2 %v400_v18 }
 0x1e0   :  { %582 = vmatpush.msra.mxu1 %v559_v50 }
 0x1e2   :  { %583 = vmatpush.msra.mxu1 %v558_v51  ;;  %v645_v51 = vld [vmem:[#allocation7 + $0x2f8] sm:$0xff] }
 0x1e4   :  { %584 = vmatpush.msra.mxu1 %v557_v53  ;;  %v644_v53 = vld [vmem:[#allocation7 + $0x2f0] sm:$0xff] }
 0x1e6   :  { %585 = vmatpush.msra.mxu1 %v556_v55  ;;  %v643_v55 = vld [vmem:[#allocation7 + $0x2e8] sm:$0xff] }
 0x1e7   :  { %427 = vmatmul.f32.gmra.mxu2 %v401_v25 }
 0x1e8   :  { %586 = vmatpush.msra.mxu1 %v555_v57  ;;  %v642_v57 = vld [vmem:[#allocation7 + $0x2e0] sm:$0xff] }
 0x1ea   :  { %726 = vmatpush.msrb.mxu1 %v1525_v60 }
 0x1ec   :  { %727 = vmatpush.msrb.mxu1 %v1527_v61 }
 0x1ee   :  { %728 = vmatpush.msrb.mxu1 %v1531_v62 }
 0x1f0   :  { %729 = vmatpush.msrb.mxu1 %v1535_v63 }
 0x1f2   :  { %730 = vmatpush.msrb.mxu1 %v1539_v0 }
 0x1f4   :  { %731 = vmatpush.msrb.mxu1 %v1543_v3 }
 0x1f6   :  { %732 = vmatpush.msrb.mxu1 %v1547_v4 }
 0x1f8   :  { %733 = vmatpush.msrb.mxu1 %v1551_v5 }
 0x1fa   :  { %734 = vmatpush.msrb.mxu1 %v1555_v8 }
 0x1fc   :  { %735 = vmatpush.msrb.mxu1 %v1559_v11 }
 0x1fe   :  { %736 = vmatpush.msrb.mxu1 %v1563_v12 }
 0x200   :  { %737 = vmatpush.msrb.mxu1 %v1567_v13 }
 0x202   :  { %738 = vmatpush.msrb.mxu1 %v1571_v14 }
 0x204   :  { %739 = vmatpush.msrb.mxu1 %v1577_v21 }
 0x206   :  { %740 = vmatpush.msrb.mxu1 %v1581_v22 }
 0x208   :  { %741 = vmatpush.msrb.mxu1 %v1585_v23 }
 0x252   :  { %v419_v26 = vpop.f32.mrf.mxu2 }
 0x25a   :  { %v422_v27 = vpop.f32.mrf.mxu2 }
 0x25b   :  { %v431_v38 = vadd.f32 %v422_v27, %v419_v26  ;;  %v452_v27 = vld [vmem:[%s1748_s4] sm:$0x1] }
 0x262   :  { %v425_v34 = vpop.f32.mrf.mxu2 }
 0x263   :  { %v432_v40 = vadd.f32 %v431_v38, %v425_v34 }
 0x26a   :  { %v428_v41 = vpop.f32.mrf.mxu2 }
 0x26b   :  { %v433_v43 = vadd.f32 %v432_v40, %v428_v41 }
 0x26d   :  { %v434_v47 = vrot.slane %v433_v43, 4 }
 0x26f   :  { %v435_v49 = vadd.f32 %v434_v47, %v433_v43  ;;  %v552_v47 = vld [vmem:[#allocation7 + $0x1f0] sm:$0xff] }
 0x270   :  { %601 = vmatpush.msra.mxu2 %v552_v47 }
 0x271   :  { %v436_v52 = vrot.slane %v435_v49, 2 }
 0x273   :  { %v437_v54 = vadd.f32 %v436_v52, %v435_v49  ;;  %v551_v49 = vld [vmem:[#allocation7 + $0x1e8] sm:$0xff]  ;;  %v550_v52 = vld [vmem:[#allocation7 + $0x1e0] sm:$0xff] }
 0x274   :  { %602 = vmatpush.msra.mxu2 %v551_v49 }
 0x275   :  { %v438_v56 = vrot.slane %v437_v54, 1 }
 0x276   :  { %603 = vmatpush.msra.mxu2 %v550_v52 }
 0x277   :  { %v439_v58 = vadd.f32 %v438_v56, %v437_v54  ;;  %v549_v54 = vld [vmem:[#allocation7 + $0x1d8] sm:$0xff]  ;;  %v548_v56 = vld [vmem:[#allocation7 + $0x1d0] sm:$0xff] }
 0x278   :  { %604 = vmatpush.msra.mxu2 %v549_v54 }
 0x279   :  { %v440_v59 = vmul.f32 0.001953125, %v439_v58  ;;  %v547_v58 = vld [vmem:[#allocation7 + $0x1c8] sm:$0xff] }
 0x27a   :  { %605 = vmatpush.msra.mxu2 %v548_v56 }
 0x27b   :  { %v441_v1 = vadd.f32 1e-05, %v440_v59  ;;  %v546_v59 = vld [vmem:[#allocation7 + $0x1c0] sm:$0xff] }
 0x27c   :  { %606 = vmatpush.msra.mxu2 %v547_v58 }
 0x27d   :  { %1215 = vrsqrt.f32 %v441_v1  ;;  %vm448_vm2 = vweird.f32 %v441_v1 }
 0x27e   :  { %607 = vmatpush.msra.mxu2 %v546_v59 }
 0x283   :  { %v1216_v2 = vpop.eup %1215 }
 0x284   :  { %v443_v10 = vmul.f32 %v1216_v2, %v441_v1  ;;  %vm449_vm1 = vweird.f32 %v1216_v2  ;;  %v545_v1 = vld [vmem:[#allocation7 + $0x1b8] sm:$0xff] }
 0x285   :  { %vm450_vm3 = vmor %vm448_vm2, %vm449_vm1  ;;  %608 = vmatpush.msra.mxu2 %v545_v1 }
 0x286   :  { %v444_v16 = vmul.f32 %v1216_v2, %v443_v10  ;;  %v638_v10 = vld [vmem:[#allocation7 + $0x2c0] sm:$0xff] }
 0x288   :  { %v445_v18 = vmul.f32 0.5, %v444_v16  ;;  %v541_v16 = vld [vmem:[#allocation7 + $0x198] sm:$0xff] }
 0x28a   :  { %v446_v25 = vsub.f32 1.5, %v445_v18  ;;  %v634_v18 = vld [vmem:[#allocation7 + $0x2a0] sm:$0xff] }
 0x28c   :  { %v447_v26 = vmul.f32 %v1216_v2, %v446_v25  ;;  %v540_v25 = vld [vmem:[#allocation7 + $0x190] sm:$0xff] }
 0x28e   :  { %v451_v28 = vsel %vm450_vm3, %v1216_v2, %v447_v26  ;;  %v639_v2 = vld [vmem:[#allocation7 + $0x2c8] sm:$0xff]  ;;  %v633_v26 = vld [vmem:[#allocation7 + $0x298] sm:$0xff] }
 0x28f   :  { %v453_v29 = vmul.f32 %v452_v27, %v451_v28  ;;  %v539_v27 = vld [vmem:[#allocation7 + $0x188] sm:$0xff]  ;;  %v632_v28 = vld [vmem:[#allocation7 + $0x290] sm:$0xff] }
 0x291   :  { %v454_v30 = vperm.slane %v453_v29, 0  ;;  %v538_v29 = vld [vmem:[#allocation7 + $0x180] sm:$0xff] }
 0x293   :  { %v458_v34 = vmul.f32 %v454_v30, %v1601_v24  ;;  %v455_v35 = vmul.f32 %v454_v30, %v1589_v9  ;;  %v457_v36 = vmul.f32 %v454_v30, %v1597_v17  ;;  %v456_v37 = vmul.f32 %v454_v30, %v1593_v15  ;;  %v631_v30 = vld [vmem:[#allocation7 + $0x288] sm:$0xff] }
 0x295   :  { %v466_v38 = vadd.f32 %v1212_v31, %v458_v34  ;;  %v463_v39 = vadd.f32 %v1212_v31, %v455_v35  ;;  %v465_v40 = vadd.f32 %v1212_v31, %v457_v36  ;;  %v464_v41 = vadd.f32 %v1212_v31, %v456_v37  ;;  %v630_v31 = vld [vmem:[#allocation7 + $0x280] sm:$0xff] }
 0x297   :  { %vm470_vm4 = vcmp.gt.f32.partialorder %v466_v38, 0.0  ;;  %v474_v42 = vmul.f32 0.01, %v466_v38  ;;  %vm467_vm5 = vcmp.gt.f32.partialorder %v463_v39, 0.0  ;;  %v471_v43 = vmul.f32 0.01, %v463_v39 }
 0x298   :  { %vm469_vm6 = vcmp.gt.f32.partialorder %v465_v40, 0.0  ;;  %v473_v24 = vmul.f32 0.01, %v465_v40  ;;  %v472_v15 = vmul.f32 0.01, %v464_v41  ;;  %vm468_vm7 = vcmp.gt.f32.partialorder %v464_v41, 0.0 }
 0x299   :  { %v1628_v9 = vsel %vm470_vm4, %v466_v38, %v474_v42  ;;  %v475_v17 = vsel %vm467_vm5, %v463_v39, %v471_v43 }
 0x29a   :  { %491 = vmatpush.msrb.mxu3 %v1628_v9  ;;  %520 = vmatpush.msra.mxu0 %v1628_v9  ;;  %v477_v48 = vsel %vm469_vm6, %v465_v40, %v473_v24  ;;  %v476_v50 = vsel %vm468_vm7, %v464_v41, %v472_v15 }
 0x29b   :  { %587 = vmatmul.f32.vlgmr.msra.gmra.mxu1 %v475_v17 }
 0x29c   :  { %492 = vmatpush.msrb.mxu3 %v477_v48  ;;  %521 = vmatpush.msra.mxu0 %v477_v48 }
 0x29e   :  { %493 = vmatpush.msrb.mxu3 %v476_v50  ;;  %522 = vmatpush.msra.mxu0 %v476_v50 }
 0x2a0   :  { %494 = vmatpush.msrb.mxu3 %v475_v17  ;;  %523 = vmatpush.msra.mxu0 %v475_v17 }
 0x2a1   :  { %1168 = vmatmul.msk.f32.vlgmr.msrb.gmra.mxu3 %vm131_vm0, %v1486_v6  ;;  %1172 = vmatmul.msk.f32.vlgmr.msra.gmra.mxu0 %vm131_vm0, %v1489_v7  ;;  %v641_v6 = vld [vmem:[#allocation7 + $0x2d8] sm:$0xff]  ;;  %v640_v7 = vld [vmem:[#allocation7 + $0x2d0] sm:$0xff] }
 0x2a2   :  { %646 = vmatpush.msra.mxu3 %v645_v51  ;;  %679 = vmatpush.msrb.mxu0 %v1525_v60 }
 0x2a3   :  { %590 = vmatmul.f32.gmra.mxu1 %v476_v50 }
 0x2a4   :  { %647 = vmatpush.msra.mxu3 %v644_v53  ;;  %680 = vmatpush.msrb.mxu0 %v1527_v61 }
 0x2a6   :  { %648 = vmatpush.msra.mxu3 %v643_v55  ;;  %681 = vmatpush.msrb.mxu0 %v1531_v62 }
 0x2a8   :  { %649 = vmatpush.msra.mxu3 %v642_v57  ;;  %682 = vmatpush.msrb.mxu0 %v1535_v63 }
 0x2a9   :  { %1169 = vmatmul.msk.f32.gmra.mxu3 %vm131_vm0, %v1497_v19  ;;  %1173 = vmatmul.msk.f32.gmra.mxu0 %vm131_vm0, %v1499_v20  ;;  %v544_v19 = vld [vmem:[#allocation7 + $0x1b0] sm:$0xff]  ;;  %v637_v20 = vld [vmem:[#allocation7 + $0x2b8] sm:$0xff] }
 0x2aa   :  { %650 = vmatpush.msra.mxu3 %v641_v6  ;;  %683 = vmatpush.msrb.mxu0 %v1539_v0 }
 0x2ab   :  { %593 = vmatmul.f32.gmra.mxu1 %v477_v48  ;;  %609 = vmatpush.msra.mxu2 %v544_v19 }
 0x2ac   :  { %651 = vmatpush.msra.mxu3 %v640_v7  ;;  %684 = vmatpush.msrb.mxu0 %v1543_v3 }
 0x2ae   :  { %652 = vmatpush.msra.mxu3 %v639_v2  ;;  %685 = vmatpush.msrb.mxu0 %v1547_v4 }
 0x2b0   :  { %653 = vmatpush.msra.mxu3 %v638_v10  ;;  %686 = vmatpush.msrb.mxu0 %v1551_v5 }
 0x2b1   :  { %1170 = vmatmul.msk.f32.gmra.mxu3 %vm131_vm0, %v1505_v32  ;;  %1174 = vmatmul.msk.f32.gmra.mxu0 %vm131_vm0, %v1507_v33  ;;  %v543_v32 = vld [vmem:[#allocation7 + $0x1a8] sm:$0xff]  ;;  %v636_v33 = vld [vmem:[#allocation7 + $0x2b0] sm:$0xff] }
 0x2b2   :  { %687 = vmatpush.msrb.mxu0 %v1555_v8  ;;  %654 = vmatpush.msra.mxu3 %v637_v20 }
 0x2b3   :  { %596 = vmatmul.f32.gmra.mxu1 %v1628_v9  ;;  %610 = vmatpush.msra.mxu2 %v543_v32 }
 0x2b4   :  { %688 = vmatpush.msrb.mxu0 %v1559_v11  ;;  %655 = vmatpush.msra.mxu3 %v636_v33 }
 0x2b6   :  { %689 = vmatpush.msrb.mxu0 %v1563_v12 }
 0x2b8   :  { %690 = vmatpush.msrb.mxu0 %v1567_v13 }
 0x2b9   :  { %1171 = vmatmul.msk.f32.gmra.mxu3 %vm131_vm0, %v1513_v45  ;;  %1175 = vmatmul.msk.f32.gmra.mxu0 %vm131_vm0, %v1515_v46  ;;  %v542_v45 = vld [vmem:[#allocation7 + $0x1a0] sm:$0xff]  ;;  %v635_v46 = vld [vmem:[#allocation7 + $0x2a8] sm:$0xff] }
 0x2ba   :  { %691 = vmatpush.msrb.mxu0 %v1571_v14  ;;  %611 = vmatpush.msra.mxu2 %v542_v45 }
 0x2bb   :  { %656 = vmatpush.msra.mxu3 %v635_v46 }
 0x2bc   :  { %692 = vmatpush.msrb.mxu0 %v1577_v21  ;;  %612 = vmatpush.msra.mxu2 %v541_v16 }
 0x2bd   :  { %657 = vmatpush.msra.mxu3 %v634_v18 }
 0x2be   :  { %693 = vmatpush.msrb.mxu0 %v1581_v22  ;;  %613 = vmatpush.msra.mxu2 %v540_v25 }
 0x2bf   :  { %658 = vmatpush.msra.mxu3 %v633_v26 }
 0x2c0   :  { %694 = vmatpush.msrb.mxu0 %v1585_v23  ;;  %614 = vmatpush.msra.mxu2 %v539_v27 }
 0x2c1   :  { %659 = vmatpush.msra.mxu3 %v632_v28 }
 0x2c2   :  { %615 = vmatpush.msra.mxu2 %v538_v29 }
 0x2c3   :  { %660 = vmatpush.msra.mxu3 %v631_v30 }
 0x2c5   :  { %661 = vmatpush.msra.mxu3 %v630_v31 }
 0x318   :  { %v588_v42 = vpop.f32.mrf.mxu1 }
 0x31e   :  { %v525_v34 = vpop.f32.mrf.mxu0 }
 0x31f   :  { %662 = vmatmul.f32.vlgmr.msra.gmra.mxu3 %v525_v34 }
 0x320   :  { %v591_v17 = vpop.f32.mrf.mxu1 }
 0x324   :  { %v496_v35 = vpop.f32.mrf.mxu3 }
 0x325   :  { %616 = vmatmul.f32.vlgmr.msra.gmra.mxu2 %v496_v35 }
 0x326   :  { %v528_v36 = vpop.f32.mrf.mxu0 }
 0x327   :  { %665 = vmatmul.f32.gmra.mxu3 %v528_v36 }
 0x328   :  { %v594_v50 = vpop.f32.mrf.mxu1 }
 0x32c   :  { %v499_v37 = vpop.f32.mrf.mxu3 }
 0x32d   :  { %619 = vmatmul.f32.gmra.mxu2 %v499_v37 }
 0x32e   :  { %v531_v38 = vpop.f32.mrf.mxu0 }
 0x32f   :  { %668 = vmatmul.f32.gmra.mxu3 %v531_v38  ;;  %v896_v38 = vld [vmem:[#allocation7 + $0x3f8] sm:$0xff] }
 0x330   :  { %v597_v55 = vpop.f32.mrf.mxu1  ;;  %897 = vmatpush.msra.mxu0 %v896_v38  ;;  %v879_v38 = vld [vmem:[#allocation7 + $0x378] sm:$0xff] }
 0x331   :  { %926 = vmatpush.msra.mxu1 %v879_v38 }
 0x334   :  { %v502_v39 = vpop.f32.mrf.mxu3 }
 0x335   :  { %622 = vmatmul.f32.gmra.mxu2 %v502_v39  ;;  %v895_v39 = vld [vmem:[#allocation7 + $0x3f0] sm:$0xff] }
 0x336   :  { %v534_v40 = vpop.f32.mrf.mxu0  ;;  %898 = vmatpush.msra.mxu0 %v895_v39  ;;  %v878_v39 = vld [vmem:[#allocation7 + $0x370] sm:$0xff] }
 0x337   :  { %671 = vmatmul.f32.gmra.mxu3 %v534_v40  ;;  %v894_v40 = vld [vmem:[#allocation7 + $0x3e8] sm:$0xff]  ;;  %927 = vmatpush.msra.mxu1 %v878_v39 }
 0x338   :  { %899 = vmatpush.msra.mxu0 %v894_v40 }
 0x33c   :  { %v505_v41 = vpop.f32.mrf.mxu3 }
 0x33d   :  { %625 = vmatmul.f32.gmra.mxu2 %v505_v41  ;;  %v893_v41 = vld [vmem:[#allocation7 + $0x3e0] sm:$0xff] }
 0x33e   :  { %900 = vmatpush.msra.mxu0 %v893_v41  ;;  %v877_v41 = vld [vmem:[#allocation7 + $0x368] sm:$0xff] }
 0x33f   :  { %928 = vmatpush.msra.mxu1 %v877_v41 }
 0x3a2   :  { %v663_v43 = vpop.f32.mrf.mxu3 }
 0x3a8   :  { %v617_v24 = vpop.f32.mrf.mxu2 }
 0x3a9   :  { %v618_v9 = vadd.f32 %v617_v24, %v588_v42  ;;  %v891_v24 = vld [vmem:[#allocation7 + $0x3d0] sm:$0xff] }
 0x3aa   :  { %v666_v44 = vpop.f32.mrf.mxu3 }
 0x3ab   :  { %v675_v15 = vadd.f32 %v663_v43, %v618_v9  ;;  %v892_v43 = vld [vmem:[#allocation7 + $0x3d8] sm:$0xff] }
 0x3ac   :  { %901 = vmatpush.msra.mxu0 %v892_v43  ;;  %v971_v43 = vld [vmem:[#allocation7 + $0x478] sm:$0xff] }
 0x3ad   :  { %695 = vmatmul.f32.vlgmr.msrb.gmra.mxu0 %v675_v15 }
 0x3ae   :  { %902 = vmatpush.msra.mxu0 %v891_v24  ;;  %v876_v24 = vld [vmem:[#allocation7 + $0x360] sm:$0xff] }
 0x3af   :  { %929 = vmatpush.msra.mxu1 %v876_v24 }
 0x3b0   :  { %v620_v47 = vpop.f32.mrf.mxu2 }
 0x3b1   :  { %v621_v48 = vadd.f32 %v620_v47, %v591_v17  ;;  %v890_v17 = vld [vmem:[#allocation7 + $0x3c8] sm:$0xff] }
 0x3b2   :  { %v669_v51 = vpop.f32.mrf.mxu3  ;;  %903 = vmatpush.msra.mxu0 %v890_v17  ;;  %v1222_v17 = vld [vmem:[#allocation5 + $0x20] sm:$0xff] }
 0x3b3   :  { %v676_v49 = vadd.f32 %v666_v44, %v621_v48  ;;  %v889_v44 = vld [vmem:[#allocation7 + $0x3c0] sm:$0xff] }
 0x3b4   :  { %904 = vmatpush.msra.mxu0 %v889_v44  ;;  %v875_v44 = vld [vmem:[#allocation7 + $0x358] sm:$0xff] }
 0x3b5   :  { %698 = vmatmul.f32.gmra.mxu0 %v676_v49  ;;  %930 = vmatpush.msra.mxu1 %v875_v44 }
 0x3b8   :  { %v623_v52 = vpop.f32.mrf.mxu2 }
 0x3b9   :  { %v624_v53 = vadd.f32 %v623_v52, %v594_v50 }
 0x3ba   :  { %v672_v57 = vpop.f32.mrf.mxu3 }
 0x3bb   :  { %v677_v54 = vadd.f32 %v669_v51, %v624_v53  ;;  %v887_v51 = vld [vmem:[#allocation7 + $0x3b0] sm:$0xff]  ;;  %v886_v53 = vld [vmem:[#allocation7 + $0x3a8] sm:$0xff] }
 0x3bd   :  { %701 = vmatmul.f32.gmra.mxu0 %v677_v54 }
 0x3c0   :  { %v626_v56 = vpop.f32.mrf.mxu2 }
 0x3c1   :  { %v627_v58 = vadd.f32 %v626_v56, %v597_v55  ;;  %v885_v55 = vld [vmem:[#allocation7 + $0x3a0] sm:$0xff]  ;;  %v884_v56 = vld [vmem:[#allocation7 + $0x398] sm:$0xff] }
 0x3c3   :  { %v678_v6 = vadd.f32 %v672_v57, %v627_v58  ;;  %v883_v58 = vld [vmem:[#allocation7 + $0x390] sm:$0xff] }
 0x3c5   :  { %704 = vmatmul.f32.gmra.mxu0 %v678_v6 }
 0x42a   :  { %v696_v59 = vpop.f32.mrf.mxu0 }
 0x432   :  { %v699_v7 = vpop.f32.mrf.mxu0 }
 0x433   :  { %v708_v2 = vadd.f32 %v699_v7, %v696_v59  ;;  %v882_v59 = vld [vmem:[#allocation7 + $0x388] sm:$0xff] }
 0x43a   :  { %v702_v1 = vpop.f32.mrf.mxu0 }
 0x43b   :  { %v709_v10 = vadd.f32 %v708_v2, %v702_v1  ;;  %v881_v1 = vld [vmem:[#allocation7 + $0x380] sm:$0xff] }
 0x442   :  { %v705_v19 = vpop.f32.mrf.mxu0 }
 0x443   :  { %v710_v20 = vadd.f32 %v709_v10, %v705_v19 }
 0x445   :  { %v711_v32 = vrot.slane %v710_v20, 4 }
 0x447   :  { %v712_v33 = vadd.f32 %v711_v32, %v710_v20 }
 0x449   :  { %v713_v45 = vrot.slane %v712_v33, 2 }
 0x44b   :  { %v714_v46 = vadd.f32 %v713_v45, %v712_v33 }
 0x44d   :  { %v715_v16 = vrot.slane %v714_v46, 1 }
 0x44f   :  { %v716_v18 = vadd.f32 %v715_v16, %v714_v46  ;;  %v1213_v16 = vld [vmem:[#allocation10 + $0x1] ss:$0 sm:$0xff] }
 0x451   :  { %v717_v25 = vmul.f32 0.001953125, %v716_v18 }
 0x453   :  { %v1665_v26 = vsub.f32 %v675_v15, %v717_v25  ;;  %v1669_v28 = vsub.f32 %v676_v49, %v717_v25  ;;  %v1673_v30 = vsub.f32 %v677_v54, %v717_v25  ;;  %v1677_v34 = vsub.f32 %v678_v6, %v717_v25  ;;  %v888_v49 = vld [vmem:[#allocation7 + $0x3b8] sm:$0xff] }
 0x454   :  { %905 = vmatpush.msra.mxu0 %v888_v49  ;;  %v968_v49 = vld [vmem:[#allocation7 + $0x460] sm:$0xff] }
 0x455   :  { %v722_v27 = vmul.f32 %v1665_v26, %v1665_v26  ;;  %v723_v29 = vmul.f32 %v1669_v28, %v1669_v28  ;;  %v724_v31 = vmul.f32 %v1673_v30, %v1673_v30  ;;  %v725_v35 = vmul.f32 %v1677_v34, %v1677_v34 }
 0x456   :  { %906 = vmatpush.msra.mxu0 %v887_v51  ;;  %v967_v51 = vld [vmem:[#allocation7 + $0x458] sm:$0xff] }
 0x457   :  { %742 = vmatmul.f32.vlgmr.msrb.gmra.mxu1 %v722_v27 }
 0x458   :  { %907 = vmatpush.msra.mxu0 %v886_v53  ;;  %v1223_v53 = vld [vmem:[#allocation5 + $0x8] sm:$0xff] }
 0x45a   :  { %908 = vmatpush.msra.mxu0 %v885_v55  ;;  %v871_v55 = vld [vmem:[#allocation7 + $0x338] sm:$0xff] }
 0x45c   :  { %909 = vmatpush.msra.mxu0 %v884_v56  ;;  %v1715_v56 = vld [vmem:[#allocation8 + $0x60] sm:$0xff] }
 0x45e   :  { %910 = vmatpush.msra.mxu0 %v883_v58  ;;  %v963_v58 = vld [vmem:[#allocation7 + $0x438] sm:$0xff] }
 0x45f   :  { %745 = vmatmul.f32.gmra.mxu1 %v723_v29 }
 0x460   :  { %911 = vmatpush.msra.mxu0 %v882_v59  ;;  %v1228_v59 = vld [vmem:[#allocation5 + $0x10] sm:$0xff] }
 0x462   :  { %912 = vmatpush.msra.mxu0 %v881_v1  ;;  %v1230_v1 = vld [vmem:[#allocation8 + $0x48] sm:$0xff] }
 0x464   :  { %1052 = vmatpush.msrb.mxu0 %v1525_v60 }
 0x466   :  { %1053 = vmatpush.msrb.mxu0 %v1527_v61 }
 0x467   :  { %748 = vmatmul.f32.gmra.mxu1 %v724_v31 }
 0x468   :  { %1054 = vmatpush.msrb.mxu0 %v1531_v62 }
 0x46a   :  { %1055 = vmatpush.msrb.mxu0 %v1535_v63  ;;  %v1176_v63 = vld [vmem:[%s1748_s4 + $0x1] sm:$0x1] }
 0x46c   :  { %1056 = vmatpush.msrb.mxu0 %v1539_v0 }
 0x46e   :  { %1057 = vmatpush.msrb.mxu0 %v1543_v3 }
 0x46f   :  { %751 = vmatmul.f32.gmra.mxu1 %v725_v35 }
 0x470   :  { %1058 = vmatpush.msrb.mxu0 %v1547_v4 }
 0x472   :  { %1059 = vmatpush.msrb.mxu0 %v1551_v5 }
 0x474   :  { %1060 = vmatpush.msrb.mxu0 %v1555_v8 }
 0x476   :  { %1061 = vmatpush.msrb.mxu0 %v1559_v11 }
 0x478   :  { %1062 = vmatpush.msrb.mxu0 %v1563_v12 }
 0x47a   :  { %1063 = vmatpush.msrb.mxu0 %v1567_v13 }
 0x47c   :  { %1064 = vmatpush.msrb.mxu0 %v1571_v14 }
 0x47e   :  { %1065 = vmatpush.msrb.mxu0 %v1577_v21 }
 0x480   :  { %1066 = vmatpush.msrb.mxu0 %v1581_v22 }
 0x482   :  { %1067 = vmatpush.msrb.mxu0 %v1585_v23 }
 0x4d4   :  { %v743_v36 = vpop.f32.mrf.mxu1 }
 0x4dc   :  { %v746_v37 = vpop.f32.mrf.mxu1 }
 0x4dd   :  { %v755_v9 = vadd.f32 %v746_v37, %v743_v36 }
 0x4e4   :  { %v749_v42 = vpop.f32.mrf.mxu1 }
 0x4e5   :  { %v756_v15 = vadd.f32 %v755_v9, %v749_v42  ;;  %v1221_v9 = vld [vmem:[#allocation5] sm:$0xff] }
 0x4ec   :  { %v752_v47 = vpop.f32.mrf.mxu1 }
 0x4ed   :  { %v757_v48 = vadd.f32 %v756_v15, %v752_v47  ;;  %v970_v15 = vld [vmem:[#allocation7 + $0x470] sm:$0xff]  ;;  %v969_v47 = vld [vmem:[#allocation7 + $0x468] sm:$0xff] }
 0x4ef   :  { %v758_v50 = vrot.slane %v757_v48, 4 }
 0x4f1   :  { %v759_v52 = vadd.f32 %v758_v50, %v757_v48  ;;  %v874_v48 = vld [vmem:[#allocation7 + $0x350] sm:$0xff]  ;;  %v873_v50 = vld [vmem:[#allocation7 + $0x348] sm:$0xff] }
 0x4f2   :  { %931 = vmatpush.msra.mxu1 %v874_v48 }
 0x4f3   :  { %v760_v54 = vrot.slane %v759_v52, 2 }
 0x4f4   :  { %932 = vmatpush.msra.mxu1 %v873_v50 }
 0x4f5   :  { %v761_v57 = vadd.f32 %v760_v54, %v759_v52  ;;  %v872_v52 = vld [vmem:[#allocation7 + $0x340] sm:$0xff]  ;;  %v1224_v54 = vld [vmem:[#allocation5 + $0x28] sm:$0xff] }
 0x4f6   :  { %933 = vmatpush.msra.mxu1 %v872_v52 }
 0x4f7   :  { %v762_v6 = vrot.slane %v761_v57, 1 }
 0x4f8   :  { %934 = vmatpush.msra.mxu1 %v871_v55 }
 0x4f9   :  { %v763_v7 = vadd.f32 %v762_v6, %v761_v57  ;;  %v1718_v57 = vld [vmem:[#allocation8 + $0x58] sm:$0xff]  ;;  %v1227_v6 = vld [vmem:[#allocation8 + $0x50] sm:$0xff] }
 0x4fb   :  { %v764_v2 = vmul.f32 0.001953125, %v763_v7  ;;  %v1229_v7 = vld [vmem:[#allocation5 + $0x30] sm:$0xff] }
 0x4fd   :  { %v765_v10 = vadd.f32 1e-05, %v764_v2  ;;  %v1231_v2 = vld [vmem:[#allocation8 + $0x40] sm:$0xff] }
 0x4ff   :  { %1217 = vrsqrt.f32 %v765_v10  ;;  %vm772_vm9 = vweird.f32 %v765_v10 }
 0x505   :  { %v1218_v19 = vpop.eup %1217 }
 0x506   :  { %v767_v20 = vmul.f32 %v1218_v19, %v765_v10  ;;  %vm773_vm8 = vweird.f32 %v1218_v19  ;;  %v1232_v10 = vld [vmem:[#allocation8 + $0x38] sm:$0xff] }
 0x507   :  { %vm774_vm10 = vmor %vm772_vm9, %vm773_vm8 }
 0x508   :  { %v768_v32 = vmul.f32 %v1218_v19, %v767_v20  ;;  %v1234_v20 = vld [vmem:[#allocation5 + $0x38] sm:$0xff] }
 0x50a   :  { %v769_v33 = vmul.f32 0.5, %v768_v32  ;;  %v870_v32 = vld [vmem:[#allocation7 + $0x330] sm:$0xff] }
 0x50b   :  { %935 = vmatpush.msra.mxu1 %v870_v32 }
 0x50c   :  { %v770_v45 = vsub.f32 1.5, %v769_v33  ;;  %v869_v33 = vld [vmem:[#allocation7 + $0x328] sm:$0xff] }
 0x50d   :  { %936 = vmatpush.msra.mxu1 %v869_v33 }
 0x50e   :  { %v771_v46 = vmul.f32 %v1218_v19, %v770_v45  ;;  %v961_v45 = vld [vmem:[#allocation7 + $0x428] sm:$0xff] }
 0x510   :  { %v775_v0 = vsel %vm774_vm10, %v1218_v19, %v771_v46  ;;  %v1233_v19 = vld [vmem:[#allocation5 + $0x18] sm:$0xff]  ;;  %v868_v46 = vld [vmem:[#allocation7 + $0x320] sm:$0xff] }
 0x511   :  { %v778_v3 = vmul.f32 %v1176_v63, %v775_v0  ;;  %v960_v63 = vld [vmem:[#allocation7 + $0x420] sm:$0xff]  ;;  %937 = vmatpush.msra.mxu1 %v868_v46 }
 0x512   :  { %v864_v0 = vld [vmem:[#allocation7 + $0x300] sm:$0xff] }
 0x513   :  { %v779_v4 = vperm.slane %v778_v3, 0  ;;  %v956_v3 = vld [vmem:[#allocation7 + $0x400] sm:$0xff] }
 0x515   :  { %v783_v5 = vmul.f32 %v779_v4, %v1677_v34  ;;  %v780_v8 = vmul.f32 %v779_v4, %v1665_v26  ;;  %v782_v18 = vmul.f32 %v779_v4, %v1673_v30  ;;  %v781_v25 = vmul.f32 %v779_v4, %v1669_v28  ;;  %v1235_v4 = vld [vmem:[#allocation8 + $0x78] sm:$0xff] }
 0x517   :  { %v792_v27 = vadd.f32 %v1213_v16, %v783_v5  ;;  %v789_v29 = vadd.f32 %v1213_v16, %v780_v8  ;;  %v791_v31 = vadd.f32 %v1213_v16, %v782_v18  ;;  %v790_v35 = vadd.f32 %v1213_v16, %v781_v25  ;;  %v1236_v16 = vld [vmem:[#allocation8 + $0x70] sm:$0xff]  ;;  %v1237_v5 = vld [vmem:[#allocation8 + $0x68] sm:$0xff]  ;;  %v1240_v25 = vld [vmem:[#allocation8 + $0x20] sm:$0xff] }
 0x518   :  { %v1238_v8 = vld [vmem:[#allocation8 + $0x30] sm:$0xff]  ;;  %v1239_v18 = vld [vmem:[#allocation8 + $0x28] sm:$0xff] }
 0x519   :  { %vm796_vm11 = vcmp.gt.f32.partialorder %v792_v27, 0.0  ;;  %v800_v36 = vmul.f32 0.01, %v792_v27  ;;  %vm793_vm12 = vcmp.gt.f32.partialorder %v789_v29, 0.0  ;;  %v797_v37 = vmul.f32 0.01, %v789_v29 }
 0x51a   :  { %vm795_vm13 = vcmp.gt.f32.partialorder %v791_v31, 0.0  ;;  %v799_v26 = vmul.f32 0.01, %v791_v31  ;;  %v798_v28 = vmul.f32 0.01, %v790_v35  ;;  %vm794_vm14 = vcmp.gt.f32.partialorder %v790_v35, 0.0 }
 0x51b   :  { %v1703_v34 = vsel %vm796_vm11, %v792_v27, %v800_v36  ;;  %v801_v30 = vsel %vm793_vm12, %v789_v29, %v797_v37  ;;  %v1241_v27 = vld [vmem:[#allocation8 + $0x18] sm:$0xff]  ;;  %v1242_v29 = vld [vmem:[#allocation8 + $0x10] sm:$0xff]  ;;  %v1244_v37 = vld [vmem:[#allocation8] sm:$0xff] }
 0x51c   :  { %817 = vmatpush.msrb.mxu2 %v1703_v34  ;;  %846 = vmatpush.msrb.mxu3 %v1703_v34  ;;  %v803_v40 = vsel %vm795_vm13, %v791_v31, %v799_v26  ;;  %v802_v42 = vsel %vm794_vm14, %v790_v35, %v798_v28  ;;  %v1243_v31 = vld [vmem:[#allocation8 + $0x8] sm:$0xff] }
 0x51d   :  { %913 = vmatmul.f32.vlgmr.msra.gmra.mxu0 %v801_v30 }
 0x51e   :  { %818 = vmatpush.msrb.mxu2 %v803_v40  ;;  %847 = vmatpush.msrb.mxu3 %v803_v40 }
 0x520   :  { %819 = vmatpush.msrb.mxu2 %v802_v42  ;;  %848 = vmatpush.msrb.mxu3 %v802_v42 }
 0x522   :  { %820 = vmatpush.msrb.mxu2 %v801_v30  ;;  %849 = vmatpush.msrb.mxu3 %v801_v30 }
 0x523   :  { %1177 = vmatmul.msk.f32.vlgmr.msrb.gmra.mxu2 %vm131_vm0, %v1221_v9  ;;  %1181 = vmatmul.msk.f32.vlgmr.msrb.gmra.mxu3 %vm131_vm0, %v1222_v17 }
 0x524   :  { %972 = vmatpush.msra.mxu2 %v971_v43  ;;  %1005 = vmatpush.msra.mxu3 %v1525_v60  ;;  %v966_v60 = vld [vmem:[#allocation7 + $0x450] sm:$0xff] }
 0x525   :  { %916 = vmatmul.f32.gmra.mxu0 %v802_v42 }
 0x526   :  { %973 = vmatpush.msra.mxu2 %v970_v15  ;;  %1006 = vmatpush.msra.mxu3 %v1527_v61  ;;  %v965_v61 = vld [vmem:[#allocation7 + $0x448] sm:$0xff] }
 0x528   :  { %974 = vmatpush.msra.mxu2 %v969_v47  ;;  %1007 = vmatpush.msra.mxu3 %v1531_v62  ;;  %v964_v62 = vld [vmem:[#allocation7 + $0x440] sm:$0xff] }
 0x52a   :  { %975 = vmatpush.msra.mxu2 %v968_v49  ;;  %1008 = vmatpush.msra.mxu3 %v1715_v56 }
 0x52b   :  { %1178 = vmatmul.msk.f32.gmra.mxu2 %vm131_vm0, %v1223_v53  ;;  %1182 = vmatmul.msk.f32.gmra.mxu3 %vm131_vm0, %v1224_v54 }
 0x52c   :  { %976 = vmatpush.msra.mxu2 %v967_v51  ;;  %1009 = vmatpush.msra.mxu3 %v1718_v57 }
 0x52d   :  { %919 = vmatmul.f32.gmra.mxu0 %v803_v40 }
 0x52e   :  { %977 = vmatpush.msra.mxu2 %v966_v60  ;;  %1010 = vmatpush.msra.mxu3 %v1227_v6 }
 0x530   :  { %978 = vmatpush.msra.mxu2 %v965_v61  ;;  %1011 = vmatpush.msra.mxu3 %v1230_v1 }
 0x532   :  { %979 = vmatpush.msra.mxu2 %v964_v62  ;;  %1012 = vmatpush.msra.mxu3 %v1231_v2 }
 0x533   :  { %1179 = vmatmul.msk.f32.gmra.mxu2 %vm131_vm0, %v1228_v59  ;;  %1183 = vmatmul.msk.f32.gmra.mxu3 %vm131_vm0, %v1229_v7 }
 0x534   :  { %980 = vmatpush.msra.mxu2 %v963_v58  ;;  %1013 = vmatpush.msra.mxu3 %v1232_v10 }
 0x535   :  { %922 = vmatmul.f32.gmra.mxu0 %v1703_v34 }
 0x536   :  { %1014 = vmatpush.msra.mxu3 %v1559_v11  ;;  %v962_v11 = vld [vmem:[#allocation7 + $0x430] sm:$0xff] }
 0x537   :  { %981 = vmatpush.msra.mxu2 %v962_v11 }
 0x538   :  { %1015 = vmatpush.msra.mxu3 %v1563_v12  ;;  %v867_v12 = vld [vmem:[#allocation7 + $0x318] sm:$0xff] }
 0x539   :  { %982 = vmatpush.msra.mxu2 %v961_v45  ;;  %938 = vmatpush.msra.mxu1 %v867_v12 }
 0x53a   :  { %1016 = vmatpush.msra.mxu3 %v1567_v13  ;;  %v959_v13 = vld [vmem:[#allocation7 + $0x418] sm:$0xff] }
 0x53b   :  { %1180 = vmatmul.msk.f32.gmra.mxu2 %vm131_vm0, %v1233_v19  ;;  %1184 = vmatmul.msk.f32.gmra.mxu3 %vm131_vm0, %v1234_v20 }
 0x53c   :  { %1017 = vmatpush.msra.mxu3 %v1571_v14  ;;  %983 = vmatpush.msra.mxu2 %v960_v63  ;;  %v866_v14 = vld [vmem:[#allocation7 + $0x310] sm:$0xff] }
 0x53d   :  { %939 = vmatpush.msra.mxu1 %v866_v14 }
 0x53e   :  { %1018 = vmatpush.msra.mxu3 %v1577_v21  ;;  %984 = vmatpush.msra.mxu2 %v959_v13  ;;  %v958_v21 = vld [vmem:[#allocation7 + $0x410] sm:$0xff] }
 0x540   :  { %1019 = vmatpush.msra.mxu3 %v1581_v22  ;;  %v865_v22 = vld [vmem:[#allocation7 + $0x308] sm:$0xff]  ;;  %985 = vmatpush.msra.mxu2 %v958_v21 }
 0x541   :  { %940 = vmatpush.msra.mxu1 %v865_v22 }
 0x542   :  { %1020 = vmatpush.msra.mxu3 %v1585_v23  ;;  %v957_v23 = vld [vmem:[#allocation7 + $0x408] sm:$0xff] }
 0x543   :  { %986 = vmatpush.msra.mxu2 %v957_v23  ;;  %941 = vmatpush.msra.mxu1 %v864_v0 }
 0x545   :  { %987 = vmatpush.msra.mxu2 %v956_v3  ;;  %1186 = vmatpush.msrb.mxu1 %v1235_v4 }
 0x547   :  { %1187 = vmatpush.msrb.mxu1 %v1236_v16 }
 0x549   :  { %1188 = vmatpush.msrb.mxu1 %v1237_v5 }
 0x54b   :  { %1189 = vmatpush.msrb.mxu1 %v1715_v56 }
 0x54d   :  { %1190 = vmatpush.msrb.mxu1 %v1718_v57 }
 0x54f   :  { %1191 = vmatpush.msrb.mxu1 %v1227_v6 }
 0x551   :  { %1192 = vmatpush.msrb.mxu1 %v1230_v1 }
 0x553   :  { %1193 = vmatpush.msrb.mxu1 %v1231_v2 }
 0x555   :  { %1194 = vmatpush.msrb.mxu1 %v1232_v10 }
 0x557   :  { %1195 = vmatpush.msrb.mxu1 %v1238_v8 }
 0x559   :  { %1196 = vmatpush.msrb.mxu1 %v1239_v18 }
 0x55b   :  { %1197 = vmatpush.msrb.mxu1 %v1240_v25 }
 0x55d   :  { %1198 = vmatpush.msrb.mxu1 %v1241_v27 }
 0x55f   :  { %1199 = vmatpush.msrb.mxu1 %v1242_v29 }
 0x561   :  { %1200 = vmatpush.msrb.mxu1 %v1243_v31 }
 0x563   :  { %1201 = vmatpush.msrb.mxu1 %v1244_v37 }
 0x59a   :  { %v914_v40 = vpop.f32.mrf.mxu0 }
 0x5a2   :  { %v917_v9 = vpop.f32.mrf.mxu0 }
 0x5a6   :  { %v822_v35 = vpop.f32.mrf.mxu2  ;;  %v851_v36 = vpop.f32.mrf.mxu3 }
 0x5a7   :  { %942 = vmatmul.f32.vlgmr.msra.gmra.mxu1 %v822_v35  ;;  %988 = vmatmul.f32.vlgmr.msra.gmra.mxu2 %v851_v36 }
 0x5aa   :  { %v920_v49 = vpop.f32.mrf.mxu0 }
 0x5ae   :  { %v825_v26 = vpop.f32.mrf.mxu2  ;;  %v854_v34 = vpop.f32.mrf.mxu3 }
 0x5af   :  { %945 = vmatmul.f32.gmra.mxu1 %v825_v26  ;;  %991 = vmatmul.f32.gmra.mxu2 %v854_v34 }
 0x5b2   :  { %v923_v54 = vpop.f32.mrf.mxu0 }
 0x5b6   :  { %v828_v30 = vpop.f32.mrf.mxu2  ;;  %v857_v28 = vpop.f32.mrf.mxu3 }
 0x5b7   :  { %948 = vmatmul.f32.gmra.mxu1 %v828_v30  ;;  %994 = vmatmul.f32.gmra.mxu2 %v857_v28 }
 0x5be   :  { %v831_v38 = vpop.f32.mrf.mxu2  ;;  %v860_v39 = vpop.f32.mrf.mxu3 }
 0x5bf   :  { %951 = vmatmul.f32.gmra.mxu1 %v831_v38  ;;  %997 = vmatmul.f32.gmra.mxu2 %v860_v39  ;;  %v1185_v39 = vld [vmem:[%s1748_s4 + $0x2] sm:$0x1]  ;;  %s1410_s4 = smov [#allocation11]  }
 0x5c0   :  { %s1143_s27 = sshll.u32 %s1410_s4, 4  ;;  %s1144_s27 = int_to_ptr.vmem [resolvable:$true] %s1143_s27 }
 0x624   :  { %v943_v41 = vpop.f32.mrf.mxu1 }
 0x625   :  { %v944_v42 = vadd.f32 %v943_v41, %v914_v40 }
 0x62a   :  { %v989_v43 = vpop.f32.mrf.mxu2 }
 0x62b   :  { %v1001_v24 = vadd.f32 %v989_v43, %v944_v42  ;;  %v1214_v43 = vld [vmem:[#allocation10 + $0x2] ss:$0 sm:$0xff] }
 0x62c   :  { %v946_v17 = vpop.f32.mrf.mxu1 }
 0x62d   :  { %1021 = vmatmul.f32.vlgmr.msra.gmra.mxu3 %v1001_v24  ;;  %v947_v15 = vadd.f32 %v946_v17, %v917_v9 }
 0x632   :  { %v992_v44 = vpop.f32.mrf.mxu2 }
 0x633   :  { %v1002_v47 = vadd.f32 %v992_v44, %v947_v15 }
 0x634   :  { %v949_v48 = vpop.f32.mrf.mxu1 }
 0x635   :  { %1024 = vmatmul.f32.gmra.mxu3 %v1002_v47  ;;  %v950_v50 = vadd.f32 %v949_v48, %v920_v49 }
 0x63a   :  { %v995_v51 = vpop.f32.mrf.mxu2 }
 0x63b   :  { %v1003_v52 = vadd.f32 %v995_v51, %v950_v50 }
 0x63c   :  { %v952_v53 = vpop.f32.mrf.mxu1 }
 0x63d   :  { %1027 = vmatmul.f32.gmra.mxu3 %v1003_v52  ;;  %v953_v60 = vadd.f32 %v952_v53, %v923_v54 }
 0x642   :  { %v998_v55 = vpop.f32.mrf.mxu2 }
 0x643   :  { %v1004_v61 = vadd.f32 %v998_v55, %v953_v60 }
 0x645   :  { %1030 = vmatmul.f32.gmra.mxu3 %v1004_v61 }
 0x6b0   :  { %v1022_v56 = vpop.f32.mrf.mxu3 }
 0x6b8   :  { %v1025_v62 = vpop.f32.mrf.mxu3 }
 0x6b9   :  { %v1034_v58 = vadd.f32 %v1025_v62, %v1022_v56  ;;  %v1245_v56 = vld [vmem:[#allocation2] sm:$0xff] }
 0x6c0   :  { %v1028_v57 = vpop.f32.mrf.mxu3 }
 0x6c1   :  { %v1035_v6 = vadd.f32 %v1034_v58, %v1028_v57  ;;  %v1246_v57 = vld [vmem:[#allocation2 + $0x8] sm:$0xff] }
 0x6c8   :  { %v1031_v59 = vpop.f32.mrf.mxu3 }
 0x6c9   :  { %v1036_v7 = vadd.f32 %v1035_v6, %v1031_v59  ;;  %v1247_v6 = vld [vmem:[#allocation2 + $0x10] sm:$0xff] }
 0x6cb   :  { %v1037_v1 = vrot.slane %v1036_v7, 4 }
 0x6cd   :  { %v1038_v2 = vadd.f32 %v1037_v1, %v1036_v7  ;;  %v1248_v7 = vld [vmem:[#allocation2 + $0x18] sm:$0xff] }
 0x6cf   :  { %v1039_v10 = vrot.slane %v1038_v2, 2 }
 0x6d1   :  { %v1040_v19 = vadd.f32 %v1039_v10, %v1038_v2 }
 0x6d3   :  { %v1041_v20 = vrot.slane %v1040_v19, 1 }
 0x6d5   :  { %v1042_v32 = vadd.f32 %v1041_v20, %v1040_v19 }
 0x6d7   :  { %v1043_v11 = vmul.f32 0.001953125, %v1042_v32 }
 0x6d9   :  { %v1044_v33 = vsub.f32 %v1001_v24, %v1043_v11  ;;  %v1045_v45 = vsub.f32 %v1002_v47, %v1043_v11  ;;  %v1046_v12 = vsub.f32 %v1003_v52, %v1043_v11  ;;  %v1047_v14 = vsub.f32 %v1004_v61, %v1043_v11 }
 0x6db   :  { %v1048_v46 = vmul.f32 %v1044_v33, %v1044_v33  ;;  %v1049_v63 = vmul.f32 %v1045_v45, %v1045_v45  ;;  %v1050_v13 = vmul.f32 %v1046_v12, %v1046_v12  ;;  %v1051_v21 = vmul.f32 %v1047_v14, %v1047_v14 }
 0x6dd   :  { %1068 = vmatmul.f32.vlgmr.msrb.gmra.mxu0 %v1048_v46  ;;  %1071 = vmatmul.f32.vlgmr.msrb.gmra.mxu1 %v1049_v63 }
 0x6e5   :  { %1074 = vmatmul.f32.gmra.mxu1 %v1050_v13 }
 0x6ed   :  { %1077 = vmatmul.f32.gmra.mxu1 %v1051_v21 }
 0x75a   :  { %v1072_v22 = vpop.f32.mrf.mxu1  ;;  %v1069_v0 = vpop.f32.mrf.mxu0 }
 0x75b   :  { %v1081_v3 = vadd.f32 %v1072_v22, %v1069_v0 }
 0x762   :  { %v1075_v23 = vpop.f32.mrf.mxu1 }
 0x763   :  { %v1082_v4 = vadd.f32 %v1081_v3, %v1075_v23 }
 0x76a   :  { %v1078_v16 = vpop.f32.mrf.mxu1 }
 0x76b   :  { %v1083_v5 = vadd.f32 %v1082_v4, %v1078_v16 }
 0x76d   :  { %v1084_v8 = vrot.slane %v1083_v5, 4 }
 0x76f   :  { %v1085_v18 = vadd.f32 %v1084_v8, %v1083_v5 }
 0x771   :  { %v1086_v25 = vrot.slane %v1085_v18, 2 }
 0x773   :  { %v1087_v27 = vadd.f32 %v1086_v25, %v1085_v18 }
 0x775   :  { %v1088_v29 = vrot.slane %v1087_v27, 1 }
 0x777   :  { %v1089_v31 = vadd.f32 %v1088_v29, %v1087_v27 }
 0x779   :  { %v1090_v35 = vmul.f32 0.001953125, %v1089_v31 }
 0x77b   :  { %v1091_v36 = vadd.f32 1e-05, %v1090_v35 }
 0x77d   :  { %1219 = vrsqrt.f32 %v1091_v36  ;;  %vm1098_vm0 = vweird.f32 %v1091_v36 }
 0x783   :  { %v1220_v37 = vpop.eup %1219 }
 0x784   :  { %v1093_v26 = vmul.f32 %v1220_v37, %v1091_v36  ;;  %vm1099_vm15 = vweird.f32 %v1220_v37 }
 0x785   :  { %vm1100_vm1 = vmor %vm1098_vm0, %vm1099_vm15 }
 0x786   :  { %v1094_v34 = vmul.f32 %v1220_v37, %v1093_v26 }
 0x788   :  { %v1095_v30 = vmul.f32 0.5, %v1094_v34 }
 0x78a   :  { %v1096_v28 = vsub.f32 1.5, %v1095_v30 }
 0x78c   :  { %v1097_v38 = vmul.f32 %v1220_v37, %v1096_v28 }
 0x78e   :  { %v1101_v40 = vsel %vm1100_vm1, %v1220_v37, %v1097_v38 }
 0x78f   :  { %v1104_v41 = vmul.f32 %v1185_v39, %v1101_v40 }
 0x791   :  { %v1105_v42 = vperm.slane %v1104_v41, 0 }
 0x793   :  { %v1106_v24 = vmul.f32 %v1105_v42, %v1044_v33  ;;  %v1107_v9 = vmul.f32 %v1105_v42, %v1045_v45  ;;  %v1108_v17 = vmul.f32 %v1105_v42, %v1046_v12  ;;  %v1109_v15 = vmul.f32 %v1105_v42, %v1047_v14 }
 0x795   :  { %v1115_v44 = vadd.f32 %v1214_v43, %v1106_v24  ;;  %v1116_v47 = vadd.f32 %v1214_v43, %v1107_v9  ;;  %v1117_v48 = vadd.f32 %v1214_v43, %v1108_v17  ;;  %v1118_v49 = vadd.f32 %v1214_v43, %v1109_v15 }
 0x797   :  { %vm1119_vm2 = vcmp.gt.f32.partialorder %v1115_v44, 0.0  ;;  %vm1120_vm3 = vcmp.gt.f32.partialorder %v1116_v47, 0.0  ;;  %vm1121_vm4 = vcmp.gt.f32.partialorder %v1117_v48, 0.0  ;;  %vm1122_vm5 = vcmp.gt.f32.partialorder %v1118_v49, 0.0 }
 0x798   :  { %v1123_v50 = vmul.f32 0.01, %v1115_v44  ;;  %v1124_v51 = vmul.f32 0.01, %v1116_v47  ;;  %v1125_v52 = vmul.f32 0.01, %v1117_v48 }
 0x799   :  { %v1126_v53 = vmul.f32 0.01, %v1118_v49 }
 0x79a   :  { %v1127_v54 = vsel %vm1119_vm2, %v1115_v44, %v1123_v50  ;;  %v1128_v60 = vsel %vm1120_vm3, %v1116_v47, %v1124_v51  ;;  %v1129_v55 = vsel %vm1121_vm4, %v1117_v48, %v1125_v52 }
 0x79b   :  { %v1130_v61 = vsel %vm1122_vm5, %v1118_v49, %v1126_v53  ;;  %v1131_v62 = vadd.f32 %v1245_v56, %v1127_v54  ;;  %v1132_v58 = vadd.f32 %v1246_v57, %v1128_v60  ;;  %v1133_v59 = vadd.f32 %v1247_v6, %v1129_v55 }
 0x79c   :  { %v1134_v1 = vadd.f32 %v1248_v7, %v1130_v61 }
 0x79d   :  { %1135 = vst [vmem:[#allocation11] sm:$0xff] %v1131_v62 }
 0x79e   :  { %1136 = vst [vmem:[#allocation11 + $0x8] sm:$0xff] %v1132_v58 }
 0x79f   :  { %1137 = vst [vmem:[#allocation11 + $0x10] sm:$0xff] %v1133_v59 }
 0x7a0   :  { %1138 = vst [vmem:[#allocation11 + $0x18] sm:$0xff] %v1134_v1 }
 0x7a1   :  { %1151 = dma.vmem_to_hbm [thread:$0]  %s1144_s27, 512, %s1146_s8, [#allocation4], %s1402_s29, %s1402_s29, %s1403_s30  }
 0x7a2   :  { %1399 = dma.done.wait [#allocation4], 512  }
 0x7a3   :  { %1400 = vsyncadd [#allocation4], 4294966784 }
 0x7a4   :  { %1156 = vsyncpa [#allocation3], 1 }
 0x7a5   :  { %1157 = vsyncpa [#allocation6], 1 }
 0x7a6   :  { %1158 = vsyncpa [#allocation9], 1 }
 0x7a7   :  { %1159 = vsyncpa [#allocation4], 1 }

</bundles_post_ra>
